<compile_context>
chip_gen: v7x
topology: tpu7x:2x2x1
jax: 0.10.0
libtpu: 0.0.40
codegen_flags: <defaults>
</compile_context>

<pallas_src>
import jax
import jax.numpy as jnp
from jax.experimental import pallas as pl
from jax.experimental.pallas import tpu as pltpu

# ---------------- hyper-parameters (module __init__ args) ----------------
B = 2            # batch
C_IN = 16        # in_channels
C_SKIP = 16      # skip_channels
IC = 32          # internal_channels
T = 64           # time steps
K = 3            # kernel_size (odd -> depthwise conv preserves length)
DIL = 2          # dilation
PAD = (K - 1) * DIL // 2
C_OS = C_IN + C_SKIP     # fused output (output || skip) channel width
NP = 8 + K               # packed parameter columns
EPS = 1e-5
INV_T = 1.0 / T
SCALE_INIT = 0.9
DTYPE = jnp.float32


# ---------------------------- Pallas kernel ------------------------------
def _fwln_scale_shift(y, gamma, beta):
    """Feature-wise layernorm on an NCL tile: each channel (sublane row of y)
    is normalized over time (lanes).

    Single reduction pass (sum + sum-of-squares, var = E[x^2] - mean^2), then
    a single fused `y*scale + shift` pass; reciprocal only on the (C,1) column.
    NOTE: E[x^2]-mean^2 is cancellation-prone when |mean| >> std; fine at these
    activation scales — switch to the two-pass form if tolerances tighten.
    """
    s1 = jnp.sum(y, axis=1, keepdims=True)            # (C, 1)
    s2 = jnp.sum(y * y, axis=1, keepdims=True)        # (C, 1)
    mean = s1 * INV_T
    var = jnp.maximum(s2 * INV_T - mean * mean, 0.0)
    std = jnp.sqrt(var)                                # population std (unbiased=False)
    scale = gamma * pl.reciprocal(std + EPS, approx=False)   # eps on std (matches module)
    shift = beta - mean * scale
    return y * scale + shift                           # one fused tile pass


def onedconv_block_kernel(
    x_ref,        # (B, C_IN, T)   NCL input
    w1_ref,       # (IC, C_IN)     conv1x1_1 weight (scale1 folded)
    wos_ref,      # (C_OS, IC)     [Wout*scale2 ; Wskip] fused
    pcols_ref,    # (IC, NP)       packed per-channel parameter columns
    bos_ref,      # (C_OS, 1)      [bout*scale2 ; bskip]
    out_ref,      # (B, C_IN, T)   NCL output
    skip_ref,     # (B, C_SKIP, T) NCL skip output
):
    # --- unpack the packed parameter slab (single DMA stream) -------------
    P = pcols_ref[...]                                  # (IC, NP)
    b1, g1, be1 = P[:, 0:1], P[:, 1:2], P[:, 2:3]
    wd = [P[:, 3 + k:4 + k] for k in range(K)]          # depthwise taps, (IC,1) each
    bd, g2, be2 = P[:, 3 + K:4 + K], P[:, 4 + K:5 + K], P[:, 5 + K:6 + K]
    a1, a2 = P[:, 6 + K:7 + K], P[:, 7 + K:8 + K]       # PReLU slopes (broadcast cols)

    w1 = w1_ref[...]                                    # (IC, C_IN)
    wos = wos_ref[...]                                  # (C_OS, IC)
    bos = bos_ref[...]                                  # (C_OS, 1)

    # --- depthwise dilated conv as shift-matrix matmuls --------------------
    # S_k[t', t] = 1 iff t - t' == PAD - k*DIL ; zero padding at the sequence
    # edges falls out automatically.  Built once, shared across batches.
    tq = jax.lax.broadcasted_iota(jnp.int32, (T, T), 0)   # source index t'
    tt = jax.lax.broadcasted_iota(jnp.int32, (T, T), 1)   # destination index t
    one = jnp.float32(1.0)
    zero = jnp.float32(0.0)
    shift_mats = []
    for k in range(K):
        s = PAD - k * DIL
        if s == 0:
            shift_mats.append(None)                       # identity tap — no matmul
        else:
            shift_mats.append(jnp.where(tt - tq == s, one, zero))

    # --- per-batch pipeline (B is small & static; single grid step) --------
    for b in range(B):
        x_b = x_ref[b]                                    # (C_IN, T)

        # conv1x1_1 (scale1 folded into w1/b1) + PReLU1 + featurewise LN1
        y = jnp.dot(w1, x_b, preferred_element_type=jnp.float32) + b1   # (IC, T)
        y = jnp.where(y >= 0.0, y, a1 * y)
        y = _fwln_scale_shift(y, g1, be1)

        # depthwise dilated conv (groups=IC), MXU shift matmuls for s != 0
        acc = bd
        for k in range(K):
            tap = wd[k] * y
            if shift_mats[k] is not None:
                tap = jnp.dot(tap, shift_mats[k], preferred_element_type=jnp.float32)
            acc = acc + tap
        y = acc

        # PReLU2 + featurewise LN2
        y = jnp.where(y >= 0.0, y, a2 * y)
        y = _fwln_scale_shift(y, g2, be2)

        # fused conv1x1_output(*scale2) || conv1x1_skip -> (C_OS, T), NCL
        o = jnp.dot(wos, y, preferred_element_type=jnp.float32) + bos
        out_ref[b] = o[:C_IN, :].astype(out_ref.dtype)
        skip_ref[b] = o[C_IN:, :].astype(skip_ref.dtype)


def _full_spec(shape):
    return pl.BlockSpec(shape, lambda i, _n=len(shape): (0,) * _n)


def onedconv_block(x, params):
    """x: [B, C_IN, T] (PyTorch NCL). Returns (output [B,C_IN,T], skip [B,C_SKIP,T])."""
    # ---- trace-time parameter folding / packing (zero in-kernel cost) ----
    s1, s2 = params["scale1"], params["scale2"]
    w1 = (params["W1"] * s1).astype(DTYPE)                               # (IC, C_IN)
    wos = jnp.concatenate([params["Wout"] * s2, params["Wskip"]], axis=0).astype(DTYPE)
    bos = jnp.concatenate([params["bout"] * s2, params["bskip"]])[:, None].astype(DTYPE)
    cols = (
        [params["b1"] * s1, params["gamma1"], params["beta1"]]
        + [params["Wd"][:, k] for k in range(K)]
        + [params["bd"], params["gamma2"], params["beta2"],
           jnp.broadcast_to(jnp.asarray(params["prelu1_a"], DTYPE), (IC,)),
           jnp.broadcast_to(jnp.asarray(params["prelu2_a"], DTYPE), (IC,))]
    )
    pcols = jnp.stack(cols, axis=1).astype(DTYPE)                        # (IC, NP)

    out, skip = pl.pallas_call(
        onedconv_block_kernel,
        out_shape=(jax.ShapeDtypeStruct((B, C_IN, T), DTYPE),
                   jax.ShapeDtypeStruct((B, C_SKIP, T), DTYPE)),
        grid_spec=pltpu.PrefetchScalarGridSpec(
            num_scalar_prefetch=0,
            grid=(1,),                       # single invocation; batch handled in-kernel
            in_specs=[
                _full_spec((B, C_IN, T)),    # x
                _full_spec((IC, C_IN)),      # W1 (scaled)
                _full_spec((C_OS, IC)),      # [Wout*scale2 ; Wskip]
                _full_spec((IC, NP)),        # packed per-channel params
                _full_spec((C_OS, 1)),       # [bout*scale2 ; bskip]
            ],
            out_specs=[
                _full_spec((B, C_IN, T)),
                _full_spec((B, C_SKIP, T)),
            ],
        ),
        compiler_params=pltpu.CompilerParams(dimension_semantics=("arbitrary",)),
    )(x.astype(DTYPE), w1, wos, pcols, bos)
    return out, skip


# ----------------------- pure-JAX reference (NCL) ------------------------
def ref_forward(x, p):
    hp = jax.lax.Precision.HIGHEST

    def fwln(y, gamma, beta):
        mean = y.mean(axis=2, keepdims=True)
        std = jnp.sqrt(((y - mean) ** 2).mean(axis=2, keepdims=True))
        y = (y - mean) / (std + EPS)
        return gamma[None, :, None] * y + beta[None, :, None]

    y = jnp.einsum("oc,bct->bot", p["W1"], x, precision=hp) + p["b1"][None, :, None]
    y = y * p["scale1"]
    y = jnp.where(y >= 0, y, p["prelu1_a"] * y)
    y = fwln(y, p["gamma1"], p["beta1"])

    yp = jnp.pad(y, ((0, 0), (0, 0), (PAD, PAD)))
    acc = jnp.zeros_like(y)
    for k in range(K):
        acc = acc + yp[:, :, k * DIL: k * DIL + T] * p["Wd"][None, :, k, None]
    y = acc + p["bd"][None, :, None]

    y = jnp.where(y >= 0, y, p["prelu2_a"] * y)
    y = fwln(y, p["gamma2"], p["beta2"])

    out = jnp.einsum("oc,bct->bot", p["Wout"], y, precision=hp) + p["bout"][None, :, None]
    out = out * p["scale2"]
    skip = jnp.einsum("oc,bct->bot", p["Wskip"], y, precision=hp) + p["bskip"][None, :, None]
    return out, skip


# --------------------------------- main ----------------------------------
if __name__ == "__main__":
    key = jax.random.PRNGKey(0)
    ks = jax.random.split(key, 8)

    params = {
        # conv1x1_1: weight [IC, C_IN, 1] -> [IC, C_IN]
        "W1": 0.1 * jax.random.normal(ks[0], (IC, C_IN), DTYPE),
        "b1": 0.01 * jax.random.normal(ks[1], (IC,), DTYPE),
        "prelu1_a": jnp.float32(0.25),                  # nn.PReLU() default
        "gamma1": jnp.ones((IC,), DTYPE),
        "beta1": jnp.zeros((IC,), DTYPE),
        # depthwise conv: weight [IC, 1, K] -> [IC, K]
        "Wd": 0.1 * jax.random.normal(ks[2], (IC, K), DTYPE),
        "bd": 0.01 * jax.random.normal(ks[3], (IC,), DTYPE),
        "prelu2_a": jnp.float32(0.25),
        "gamma2": jnp.ones((IC,), DTYPE),
        "beta2": jnp.zeros((IC,), DTYPE),
        # conv1x1_output: [C_IN, IC]
        "Wout": 0.1 * jax.random.normal(ks[4], (C_IN, IC), DTYPE),
        "bout": 0.01 * jax.random.normal(ks[5], (C_IN,), DTYPE),
        # conv1x1_skip: [C_SKIP, IC]
        "Wskip": 0.1 * jax.random.normal(ks[6], (C_SKIP, IC), DTYPE),
        "bskip": 0.01 * jax.random.normal(ks[7], (C_SKIP,), DTYPE),
        "scale1": jnp.float32(SCALE_INIT),
        "scale2": jnp.float32(SCALE_INIT),
    }

    x = jax.random.normal(jax.random.PRNGKey(1), (B, C_IN, T), DTYPE)

    out, skip = jax.jit(onedconv_block)(x, params)
    jax.block_until_ready((out, skip))

    out_ref, skip_ref = ref_forward(x, params)
    assert out.shape == (B, C_IN, T) and skip.shape == (B, C_SKIP, T)
    assert jnp.allclose(out, out_ref, atol=2e-4, rtol=2e-4)
    assert jnp.allclose(skip, skip_ref, atol=2e-4, rtol=2e-4)

    print("KERNEL_OK")
</pallas_src>

<mosaic_0001>
module attributes {stable_mosaic.version = 11 : i64} {
  func.func @onedconv_block_kernel(%arg0: i32, %arg1: memref<2x16x64xf32, #tpu.memory_space<vmem>>, %arg2: memref<32x16xf32, #tpu.memory_space<vmem>>, %arg3: memref<32x32xf32, #tpu.memory_space<vmem>>, %arg4: memref<32x11xf32, #tpu.memory_space<vmem>>, %arg5: memref<32x1xf32, #tpu.memory_space<vmem>>, %arg6: memref<2x16x64xf32, #tpu.memory_space<vmem>>, %arg7: memref<2x16x64xf32, #tpu.memory_space<vmem>>) attributes {dimension_semantics = [#tpu.dimension_semantics<arbitrary>], iteration_bounds = array<i64: 1>, scalar_prefetch = 0 : i64, scratch_operands = 0 : i64, tpu.core_type = #tpu.core_type<tc>, window_params = [{pipeline_mode = #tpu.pipeline_mode<synchronous>, transform_indices = @transform_0, window_bounds = array<i64: 2, 16, 64>}, {pipeline_mode = #tpu.pipeline_mode<synchronous>, transform_indices = @transform_1, window_bounds = array<i64: 32, 16>}, {pipeline_mode = #tpu.pipeline_mode<synchronous>, transform_indices = @transform_2, window_bounds = array<i64: 32, 32>}, {pipeline_mode = #tpu.pipeline_mode<synchronous>, transform_indices = @transform_3, window_bounds = array<i64: 32, 11>}, {pipeline_mode = #tpu.pipeline_mode<synchronous>, transform_indices = @transform_4, window_bounds = array<i64: 32, 1>}, {pipeline_mode = #tpu.pipeline_mode<synchronous>, transform_indices = @transform_5, window_bounds = array<i64: 2, 16, 64>}, {pipeline_mode = #tpu.pipeline_mode<synchronous>, transform_indices = @transform_6, window_bounds = array<i64: 2, 16, 64>}]} {
    %c0 = arith.constant 0 : index
    %c0_0 = arith.constant 0 : index
    %0 = vector.load %arg4[%c0, %c0_0] : memref<32x11xf32, #tpu.memory_space<vmem>>, vector<32x11xf32>
    %1 = vector.extract_strided_slice %0 {offsets = [0, 0], sizes = [32, 1], strides = [1, 1]} : vector<32x11xf32> to vector<32x1xf32>
    %2 = vector.extract_strided_slice %0 {offsets = [0, 1], sizes = [32, 1], strides = [1, 1]} : vector<32x11xf32> to vector<32x1xf32>
    %3 = vector.extract_strided_slice %0 {offsets = [0, 2], sizes = [32, 1], strides = [1, 1]} : vector<32x11xf32> to vector<32x1xf32>
    %4 = vector.extract_strided_slice %0 {offsets = [0, 3], sizes = [32, 1], strides = [1, 1]} : vector<32x11xf32> to vector<32x1xf32>
    %5 = vector.extract_strided_slice %0 {offsets = [0, 4], sizes = [32, 1], strides = [1, 1]} : vector<32x11xf32> to vector<32x1xf32>
    %6 = vector.extract_strided_slice %0 {offsets = [0, 5], sizes = [32, 1], strides = [1, 1]} : vector<32x11xf32> to vector<32x1xf32>
    %7 = vector.extract_strided_slice %0 {offsets = [0, 6], sizes = [32, 1], strides = [1, 1]} : vector<32x11xf32> to vector<32x1xf32>
    %8 = vector.extract_strided_slice %0 {offsets = [0, 7], sizes = [32, 1], strides = [1, 1]} : vector<32x11xf32> to vector<32x1xf32>
    %9 = vector.extract_strided_slice %0 {offsets = [0, 8], sizes = [32, 1], strides = [1, 1]} : vector<32x11xf32> to vector<32x1xf32>
    %10 = vector.extract_strided_slice %0 {offsets = [0, 9], sizes = [32, 1], strides = [1, 1]} : vector<32x11xf32> to vector<32x1xf32>
    %11 = vector.extract_strided_slice %0 {offsets = [0, 10], sizes = [32, 1], strides = [1, 1]} : vector<32x11xf32> to vector<32x1xf32>
    %c0_1 = arith.constant 0 : index
    %c0_2 = arith.constant 0 : index
    %12 = vector.load %arg2[%c0_1, %c0_2] : memref<32x16xf32, #tpu.memory_space<vmem>>, vector<32x16xf32>
    %c0_3 = arith.constant 0 : index
    %c0_4 = arith.constant 0 : index
    %13 = vector.load %arg3[%c0_3, %c0_4] : memref<32x32xf32, #tpu.memory_space<vmem>>, vector<32x32xf32>
    %c0_5 = arith.constant 0 : index
    %c0_6 = arith.constant 0 : index
    %14 = vector.load %arg5[%c0_5, %c0_6] : memref<32x1xf32, #tpu.memory_space<vmem>>, vector<32x1xf32>
    %15 = tpu.iota {dimensions = array<i32: 0>} : vector<64x64xi32>
    %16 = tpu.iota {dimensions = array<i32: 1>} : vector<64x64xi32>
    %17 = arith.subi %16, %15 : vector<64x64xi32>
    %c2_i32 = arith.constant 2 : i32
    %18 = vector.broadcast %c2_i32 : i32 to vector<64x64xi32>
    %19 = arith.cmpi eq, %17, %18 : vector<64x64xi32>
    %cst = arith.constant 1.000000e+00 : f32
    %cst_7 = arith.constant 0.000000e+00 : f32
    %20 = vector.broadcast %cst : f32 to vector<64x64xf32>
    %21 = vector.broadcast %cst_7 : f32 to vector<64x64xf32>
    %22 = arith.select %19, %20, %21 : vector<64x64xi1>, vector<64x64xf32>
    %23 = arith.subi %16, %15 : vector<64x64xi32>
    %c-2_i32 = arith.constant -2 : i32
    %24 = vector.broadcast %c-2_i32 : i32 to vector<64x64xi32>
    %25 = arith.cmpi eq, %23, %24 : vector<64x64xi32>
    %cst_8 = arith.constant 1.000000e+00 : f32
    %cst_9 = arith.constant 0.000000e+00 : f32
    %26 = vector.broadcast %cst_8 : f32 to vector<64x64xf32>
    %27 = vector.broadcast %cst_9 : f32 to vector<64x64xf32>
    %28 = arith.select %25, %26, %27 : vector<64x64xi1>, vector<64x64xf32>
    %c0_10 = arith.constant 0 : index
    %c0_11 = arith.constant 0 : index
    %c0_12 = arith.constant 0 : index
    %29 = vector.load %arg1[%c0_10, %c0_11, %c0_12] : memref<2x16x64xf32, #tpu.memory_space<vmem>>, vector<1x16x64xf32>
    %30 = vector.shape_cast %29 : vector<1x16x64xf32> to vector<16x64xf32>
    %cst_13 = arith.constant dense<0.000000e+00> : vector<32x64xf32>
    %31 = tpu.matmul %12, %30, %cst_13 {dimension_numbers = #tpu.dot_dimension_numbers<[1], [0], [0], [1], [0, 0, 1, 1], [], []>} : vector<32x16xf32>, vector<16x64xf32>, vector<32x64xf32> -> vector<32x64xf32>
    %32 = vector.broadcast %1 : vector<32x1xf32> to vector<32x64xf32>
    %33 = arith.addf %31, %32 : vector<32x64xf32>
    %cst_14 = arith.constant 0.000000e+00 : f32
    %34 = vector.broadcast %cst_14 : f32 to vector<32x64xf32>
    %35 = arith.cmpf oge, %33, %34 : vector<32x64xf32>
    %36 = vector.broadcast %10 : vector<32x1xf32> to vector<32x64xf32>
    %37 = arith.mulf %36, %33 : vector<32x64xf32>
    %38 = arith.select %35, %33, %37 : vector<32x64xi1>, vector<32x64xf32>
    %cst_15 = arith.constant dense<0.000000e+00> : vector<32xf32>
    %39 = vector.multi_reduction <add>, %38, %cst_15 [1] : vector<32x64xf32> to vector<32xf32>
    %40 = vector.shape_cast %39 : vector<32xf32> to vector<32x1xf32>
    %41 = arith.mulf %38, %38 : vector<32x64xf32>
    %cst_16 = arith.constant dense<0.000000e+00> : vector<32xf32>
    %42 = vector.multi_reduction <add>, %41, %cst_16 [1] : vector<32x64xf32> to vector<32xf32>
    %43 = vector.shape_cast %42 : vector<32xf32> to vector<32x1xf32>
    %cst_17 = arith.constant 1.562500e-02 : f32
    %44 = vector.broadcast %cst_17 : f32 to vector<32x1xf32>
    %45 = arith.mulf %40, %44 : vector<32x1xf32>
    %cst_18 = arith.constant 1.562500e-02 : f32
    %46 = vector.broadcast %cst_18 : f32 to vector<32x1xf32>
    %47 = arith.mulf %43, %46 : vector<32x1xf32>
    %48 = arith.mulf %45, %45 : vector<32x1xf32>
    %49 = arith.subf %47, %48 : vector<32x1xf32>
    %cst_19 = arith.constant 0.000000e+00 : f32
    %50 = vector.broadcast %cst_19 : f32 to vector<32x1xf32>
    %51 = arith.maximumf %49, %50 : vector<32x1xf32>
    %52 = math.sqrt %51 : vector<32x1xf32>
    %cst_20 = arith.constant 9.99999974E-6 : f32
    %53 = vector.broadcast %cst_20 : f32 to vector<32x1xf32>
    %54 = arith.addf %52, %53 : vector<32x1xf32>
    %55 = tpu.reciprocal %54 : vector<32x1xf32> -> vector<32x1xf32>
    %56 = arith.mulf %2, %55 : vector<32x1xf32>
    %57 = arith.mulf %45, %56 : vector<32x1xf32>
    %58 = arith.subf %3, %57 : vector<32x1xf32>
    %59 = vector.broadcast %56 : vector<32x1xf32> to vector<32x64xf32>
    %60 = arith.mulf %38, %59 : vector<32x64xf32>
    %61 = vector.broadcast %58 : vector<32x1xf32> to vector<32x64xf32>
    %62 = arith.addf %60, %61 : vector<32x64xf32>
    %63 = vector.broadcast %4 : vector<32x1xf32> to vector<32x64xf32>
    %64 = arith.mulf %63, %62 : vector<32x64xf32>
    %cst_21 = arith.constant dense<0.000000e+00> : vector<32x64xf32>
    %65 = tpu.matmul %64, %22, %cst_21 {dimension_numbers = #tpu.dot_dimension_numbers<[1], [0], [0], [1], [0, 0, 1, 1], [], []>} : vector<32x64xf32>, vector<64x64xf32>, vector<32x64xf32> -> vector<32x64xf32>
    %66 = vector.broadcast %7 : vector<32x1xf32> to vector<32x64xf32>
    %67 = arith.addf %66, %65 : vector<32x64xf32>
    %68 = vector.broadcast %5 : vector<32x1xf32> to vector<32x64xf32>
    %69 = arith.mulf %68, %62 : vector<32x64xf32>
    %70 = arith.addf %67, %69 : vector<32x64xf32>
    %71 = vector.broadcast %6 : vector<32x1xf32> to vector<32x64xf32>
    %72 = arith.mulf %71, %62 : vector<32x64xf32>
    %cst_22 = arith.constant dense<0.000000e+00> : vector<32x64xf32>
    %73 = tpu.matmul %72, %28, %cst_22 {dimension_numbers = #tpu.dot_dimension_numbers<[1], [0], [0], [1], [0, 0, 1, 1], [], []>} : vector<32x64xf32>, vector<64x64xf32>, vector<32x64xf32> -> vector<32x64xf32>
    %74 = arith.addf %70, %73 : vector<32x64xf32>
    %cst_23 = arith.constant 0.000000e+00 : f32
    %75 = vector.broadcast %cst_23 : f32 to vector<32x64xf32>
    %76 = arith.cmpf oge, %74, %75 : vector<32x64xf32>
    %77 = vector.broadcast %11 : vector<32x1xf32> to vector<32x64xf32>
    %78 = arith.mulf %77, %74 : vector<32x64xf32>
    %79 = arith.select %76, %74, %78 : vector<32x64xi1>, vector<32x64xf32>
    %cst_24 = arith.constant dense<0.000000e+00> : vector<32xf32>
    %80 = vector.multi_reduction <add>, %79, %cst_24 [1] : vector<32x64xf32> to vector<32xf32>
    %81 = vector.shape_cast %80 : vector<32xf32> to vector<32x1xf32>
    %82 = arith.mulf %79, %79 : vector<32x64xf32>
    %cst_25 = arith.constant dense<0.000000e+00> : vector<32xf32>
    %83 = vector.multi_reduction <add>, %82, %cst_25 [1] : vector<32x64xf32> to vector<32xf32>
    %84 = vector.shape_cast %83 : vector<32xf32> to vector<32x1xf32>
    %cst_26 = arith.constant 1.562500e-02 : f32
    %85 = vector.broadcast %cst_26 : f32 to vector<32x1xf32>
    %86 = arith.mulf %81, %85 : vector<32x1xf32>
    %cst_27 = arith.constant 1.562500e-02 : f32
    %87 = vector.broadcast %cst_27 : f32 to vector<32x1xf32>
    %88 = arith.mulf %84, %87 : vector<32x1xf32>
    %89 = arith.mulf %86, %86 : vector<32x1xf32>
    %90 = arith.subf %88, %89 : vector<32x1xf32>
    %cst_28 = arith.constant 0.000000e+00 : f32
    %91 = vector.broadcast %cst_28 : f32 to vector<32x1xf32>
    %92 = arith.maximumf %90, %91 : vector<32x1xf32>
    %93 = math.sqrt %92 : vector<32x1xf32>
    %cst_29 = arith.constant 9.99999974E-6 : f32
    %94 = vector.broadcast %cst_29 : f32 to vector<32x1xf32>
    %95 = arith.addf %93, %94 : vector<32x1xf32>
    %96 = tpu.reciprocal %95 : vector<32x1xf32> -> vector<32x1xf32>
    %97 = arith.mulf %8, %96 : vector<32x1xf32>
    %98 = arith.mulf %86, %97 : vector<32x1xf32>
    %99 = arith.subf %9, %98 : vector<32x1xf32>
    %100 = vector.broadcast %97 : vector<32x1xf32> to vector<32x64xf32>
    %101 = arith.mulf %79, %100 : vector<32x64xf32>
    %102 = vector.broadcast %99 : vector<32x1xf32> to vector<32x64xf32>
    %103 = arith.addf %101, %102 : vector<32x64xf32>
    %cst_30 = arith.constant dense<0.000000e+00> : vector<32x64xf32>
    %104 = tpu.matmul %13, %103, %cst_30 {dimension_numbers = #tpu.dot_dimension_numbers<[1], [0], [0], [1], [0, 0, 1, 1], [], []>} : vector<32x32xf32>, vector<32x64xf32>, vector<32x64xf32> -> vector<32x64xf32>
    %105 = vector.broadcast %14 : vector<32x1xf32> to vector<32x64xf32>
    %106 = arith.addf %104, %105 : vector<32x64xf32>
    %107 = vector.extract_strided_slice %106 {offsets = [0, 0], sizes = [16, 64], strides = [1, 1]} : vector<32x64xf32> to vector<16x64xf32>
    %c0_31 = arith.constant 0 : index
    %c0_32 = arith.constant 0 : index
    %c0_33 = arith.constant 0 : index
    %108 = vector.load %arg6[%c0_31, %c0_32, %c0_33] : memref<2x16x64xf32, #tpu.memory_space<vmem>>, vector<1x16x64xf32>
    %109 = vector.shape_cast %108 : vector<1x16x64xf32> to vector<16x64xf32>
    %110 = vector.shape_cast %107 : vector<16x64xf32> to vector<1x16x64xf32>
    tpu.vector_store %arg6[%c0_31, %c0_32, %c0_33], %110 {strides = array<i32>} : memref<2x16x64xf32, #tpu.memory_space<vmem>>, vector<1x16x64xf32>,
    %111 = vector.extract_strided_slice %106 {offsets = [16, 0], sizes = [16, 64], strides = [1, 1]} : vector<32x64xf32> to vector<16x64xf32>
    %c0_34 = arith.constant 0 : index
    %c0_35 = arith.constant 0 : index
    %c0_36 = arith.constant 0 : index
    %112 = vector.load %arg7[%c0_34, %c0_35, %c0_36] : memref<2x16x64xf32, #tpu.memory_space<vmem>>, vector<1x16x64xf32>
    %113 = vector.shape_cast %112 : vector<1x16x64xf32> to vector<16x64xf32>
    %114 = vector.shape_cast %111 : vector<16x64xf32> to vector<1x16x64xf32>
    tpu.vector_store %arg7[%c0_34, %c0_35, %c0_36], %114 {strides = array<i32>} : memref<2x16x64xf32, #tpu.memory_space<vmem>>, vector<1x16x64xf32>,
    %c1 = arith.constant 1 : index
    %c0_37 = arith.constant 0 : index
    %c0_38 = arith.constant 0 : index
    %115 = vector.load %arg1[%c1, %c0_37, %c0_38] : memref<2x16x64xf32, #tpu.memory_space<vmem>>, vector<1x16x64xf32>
    %116 = vector.shape_cast %115 : vector<1x16x64xf32> to vector<16x64xf32>
    %cst_39 = arith.constant dense<0.000000e+00> : vector<32x64xf32>
    %117 = tpu.matmul %12, %116, %cst_39 {dimension_numbers = #tpu.dot_dimension_numbers<[1], [0], [0], [1], [0, 0, 1, 1], [], []>} : vector<32x16xf32>, vector<16x64xf32>, vector<32x64xf32> -> vector<32x64xf32>
    %118 = vector.broadcast %1 : vector<32x1xf32> to vector<32x64xf32>
    %119 = arith.addf %117, %118 : vector<32x64xf32>
    %cst_40 = arith.constant 0.000000e+00 : f32
    %120 = vector.broadcast %cst_40 : f32 to vector<32x64xf32>
    %121 = arith.cmpf oge, %119, %120 : vector<32x64xf32>
    %122 = vector.broadcast %10 : vector<32x1xf32> to vector<32x64xf32>
    %123 = arith.mulf %122, %119 : vector<32x64xf32>
    %124 = arith.select %121, %119, %123 : vector<32x64xi1>, vector<32x64xf32>
    %cst_41 = arith.constant dense<0.000000e+00> : vector<32xf32>
    %125 = vector.multi_reduction <add>, %124, %cst_41 [1] : vector<32x64xf32> to vector<32xf32>
    %126 = vector.shape_cast %125 : vector<32xf32> to vector<32x1xf32>
    %127 = arith.mulf %124, %124 : vector<32x64xf32>
    %cst_42 = arith.constant dense<0.000000e+00> : vector<32xf32>
    %128 = vector.multi_reduction <add>, %127, %cst_42 [1] : vector<32x64xf32> to vector<32xf32>
    %129 = vector.shape_cast %128 : vector<32xf32> to vector<32x1xf32>
    %cst_43 = arith.constant 1.562500e-02 : f32
    %130 = vector.broadcast %cst_43 : f32 to vector<32x1xf32>
    %131 = arith.mulf %126, %130 : vector<32x1xf32>
    %cst_44 = arith.constant 1.562500e-02 : f32
    %132 = vector.broadcast %cst_44 : f32 to vector<32x1xf32>
    %133 = arith.mulf %129, %132 : vector<32x1xf32>
    %134 = arith.mulf %131, %131 : vector<32x1xf32>
    %135 = arith.subf %133, %134 : vector<32x1xf32>
    %cst_45 = arith.constant 0.000000e+00 : f32
    %136 = vector.broadcast %cst_45 : f32 to vector<32x1xf32>
    %137 = arith.maximumf %135, %136 : vector<32x1xf32>
    %138 = math.sqrt %137 : vector<32x1xf32>
    %cst_46 = arith.constant 9.99999974E-6 : f32
    %139 = vector.broadcast %cst_46 : f32 to vector<32x1xf32>
    %140 = arith.addf %138, %139 : vector<32x1xf32>
    %141 = tpu.reciprocal %140 : vector<32x1xf32> -> vector<32x1xf32>
    %142 = arith.mulf %2, %141 : vector<32x1xf32>
    %143 = arith.mulf %131, %142 : vector<32x1xf32>
    %144 = arith.subf %3, %143 : vector<32x1xf32>
    %145 = vector.broadcast %142 : vector<32x1xf32> to vector<32x64xf32>
    %146 = arith.mulf %124, %145 : vector<32x64xf32>
    %147 = vector.broadcast %144 : vector<32x1xf32> to vector<32x64xf32>
    %148 = arith.addf %146, %147 : vector<32x64xf32>
    %149 = vector.broadcast %4 : vector<32x1xf32> to vector<32x64xf32>
    %150 = arith.mulf %149, %148 : vector<32x64xf32>
    %cst_47 = arith.constant dense<0.000000e+00> : vector<32x64xf32>
    %151 = tpu.matmul %150, %22, %cst_47 {dimension_numbers = #tpu.dot_dimension_numbers<[1], [0], [0], [1], [0, 0, 1, 1], [], []>} : vector<32x64xf32>, vector<64x64xf32>, vector<32x64xf32> -> vector<32x64xf32>
    %152 = vector.broadcast %7 : vector<32x1xf32> to vector<32x64xf32>
    %153 = arith.addf %152, %151 : vector<32x64xf32>
    %154 = vector.broadcast %5 : vector<32x1xf32> to vector<32x64xf32>
    %155 = arith.mulf %154, %148 : vector<32x64xf32>
    %156 = arith.addf %153, %155 : vector<32x64xf32>
    %157 = vector.broadcast %6 : vector<32x1xf32> to vector<32x64xf32>
    %158 = arith.mulf %157, %148 : vector<32x64xf32>
    %cst_48 = arith.constant dense<0.000000e+00> : vector<32x64xf32>
    %159 = tpu.matmul %158, %28, %cst_48 {dimension_numbers = #tpu.dot_dimension_numbers<[1], [0], [0], [1], [0, 0, 1, 1], [], []>} : vector<32x64xf32>, vector<64x64xf32>, vector<32x64xf32> -> vector<32x64xf32>
    %160 = arith.addf %156, %159 : vector<32x64xf32>
    %cst_49 = arith.constant 0.000000e+00 : f32
    %161 = vector.broadcast %cst_49 : f32 to vector<32x64xf32>
    %162 = arith.cmpf oge, %160, %161 : vector<32x64xf32>
    %163 = vector.broadcast %11 : vector<32x1xf32> to vector<32x64xf32>
    %164 = arith.mulf %163, %160 : vector<32x64xf32>
    %165 = arith.select %162, %160, %164 : vector<32x64xi1>, vector<32x64xf32>
    %cst_50 = arith.constant dense<0.000000e+00> : vector<32xf32>
    %166 = vector.multi_reduction <add>, %165, %cst_50 [1] : vector<32x64xf32> to vector<32xf32>
    %167 = vector.shape_cast %166 : vector<32xf32> to vector<32x1xf32>
    %168 = arith.mulf %165, %165 : vector<32x64xf32>
    %cst_51 = arith.constant dense<0.000000e+00> : vector<32xf32>
    %169 = vector.multi_reduction <add>, %168, %cst_51 [1] : vector<32x64xf32> to vector<32xf32>
    %170 = vector.shape_cast %169 : vector<32xf32> to vector<32x1xf32>
    %cst_52 = arith.constant 1.562500e-02 : f32
    %171 = vector.broadcast %cst_52 : f32 to vector<32x1xf32>
    %172 = arith.mulf %167, %171 : vector<32x1xf32>
    %cst_53 = arith.constant 1.562500e-02 : f32
    %173 = vector.broadcast %cst_53 : f32 to vector<32x1xf32>
    %174 = arith.mulf %170, %173 : vector<32x1xf32>
    %175 = arith.mulf %172, %172 : vector<32x1xf32>
    %176 = arith.subf %174, %175 : vector<32x1xf32>
    %cst_54 = arith.constant 0.000000e+00 : f32
    %177 = vector.broadcast %cst_54 : f32 to vector<32x1xf32>
    %178 = arith.maximumf %176, %177 : vector<32x1xf32>
    %179 = math.sqrt %178 : vector<32x1xf32>
    %cst_55 = arith.constant 9.99999974E-6 : f32
    %180 = vector.broadcast %cst_55 : f32 to vector<32x1xf32>
    %181 = arith.addf %179, %180 : vector<32x1xf32>
    %182 = tpu.reciprocal %181 : vector<32x1xf32> -> vector<32x1xf32>
    %183 = arith.mulf %8, %182 : vector<32x1xf32>
    %184 = arith.mulf %172, %183 : vector<32x1xf32>
    %185 = arith.subf %9, %184 : vector<32x1xf32>
    %186 = vector.broadcast %183 : vector<32x1xf32> to vector<32x64xf32>
    %187 = arith.mulf %165, %186 : vector<32x64xf32>
    %188 = vector.broadcast %185 : vector<32x1xf32> to vector<32x64xf32>
    %189 = arith.addf %187, %188 : vector<32x64xf32>
    %cst_56 = arith.constant dense<0.000000e+00> : vector<32x64xf32>
    %190 = tpu.matmul %13, %189, %cst_56 {dimension_numbers = #tpu.dot_dimension_numbers<[1], [0], [0], [1], [0, 0, 1, 1], [], []>} : vector<32x32xf32>, vector<32x64xf32>, vector<32x64xf32> -> vector<32x64xf32>
    %191 = vector.broadcast %14 : vector<32x1xf32> to vector<32x64xf32>
    %192 = arith.addf %190, %191 : vector<32x64xf32>
    %193 = vector.extract_strided_slice %192 {offsets = [0, 0], sizes = [16, 64], strides = [1, 1]} : vector<32x64xf32> to vector<16x64xf32>
    %c1_57 = arith.constant 1 : index
    %c0_58 = arith.constant 0 : index
    %c0_59 = arith.constant 0 : index
    %194 = vector.load %arg6[%c1_57, %c0_58, %c0_59] : memref<2x16x64xf32, #tpu.memory_space<vmem>>, vector<1x16x64xf32>
    %195 = vector.shape_cast %194 : vector<1x16x64xf32> to vector<16x64xf32>
    %196 = vector.shape_cast %193 : vector<16x64xf32> to vector<1x16x64xf32>
    tpu.vector_store %arg6[%c1_57, %c0_58, %c0_59], %196 {strides = array<i32>} : memref<2x16x64xf32, #tpu.memory_space<vmem>>, vector<1x16x64xf32>,
    %197 = vector.extract_strided_slice %192 {offsets = [16, 0], sizes = [16, 64], strides = [1, 1]} : vector<32x64xf32> to vector<16x64xf32>
    %c1_60 = arith.constant 1 : index
    %c0_61 = arith.constant 0 : index
    %c0_62 = arith.constant 0 : index
    %198 = vector.load %arg7[%c1_60, %c0_61, %c0_62] : memref<2x16x64xf32, #tpu.memory_space<vmem>>, vector<1x16x64xf32>
    %199 = vector.shape_cast %198 : vector<1x16x64xf32> to vector<16x64xf32>
    %200 = vector.shape_cast %197 : vector<16x64xf32> to vector<1x16x64xf32>
    tpu.vector_store %arg7[%c1_60, %c0_61, %c0_62], %200 {strides = array<i32>} : memref<2x16x64xf32, #tpu.memory_space<vmem>>, vector<1x16x64xf32>,
    return
  }
  func.func @transform_0(%arg0: i32) -> (i32, i32, i32) {
    %c0_i32 = arith.constant 0 : i32
    %c0_i32_0 = arith.constant 0 : i32
    %c0_i32_1 = arith.constant 0 : i32
    %c0_i32_2 = arith.constant 0 : i32
    return %c0_i32, %c0_i32_0, %c0_i32_1 : i32, i32, i32
  }
  func.func @transform_1(%arg0: i32) -> (i32, i32) {
    %c0_i32 = arith.constant 0 : i32
    %c0_i32_0 = arith.constant 0 : i32
    %c0_i32_1 = arith.constant 0 : i32
    return %c0_i32, %c0_i32_0 : i32, i32
  }
  func.func @transform_2(%arg0: i32) -> (i32, i32) {
    %c0_i32 = arith.constant 0 : i32
    %c0_i32_0 = arith.constant 0 : i32
    %c0_i32_1 = arith.constant 0 : i32
    return %c0_i32, %c0_i32_0 : i32, i32
  }
  func.func @transform_3(%arg0: i32) -> (i32, i32) {
    %c0_i32 = arith.constant 0 : i32
    %c0_i32_0 = arith.constant 0 : i32
    %c0_i32_1 = arith.constant 0 : i32
    return %c0_i32, %c0_i32_0 : i32, i32
  }
  func.func @transform_4(%arg0: i32) -> (i32, i32) {
    %c0_i32 = arith.constant 0 : i32
    %c0_i32_0 = arith.constant 0 : i32
    %c0_i32_1 = arith.constant 0 : i32
    return %c0_i32, %c0_i32_0 : i32, i32
  }
  func.func @transform_5(%arg0: i32) -> (i32, i32, i32) {
    %c0_i32 = arith.constant 0 : i32
    %c0_i32_0 = arith.constant 0 : i32
    %c0_i32_1 = arith.constant 0 : i32
    %c0_i32_2 = arith.constant 0 : i32
    return %c0_i32, %c0_i32_0, %c0_i32_1 : i32, i32, i32
  }
  func.func @transform_6(%arg0: i32) -> (i32, i32, i32) {
    %c0_i32 = arith.constant 0 : i32
    %c0_i32_0 = arith.constant 0 : i32
    %c0_i32_1 = arith.constant 0 : i32
    %c0_i32_2 = arith.constant 0 : i32
    return %c0_i32, %c0_i32_0, %c0_i32_1 : i32, i32, i32
  }
}

</mosaic_0001>

<bundles_post_ra>
// kernel: onedconv_block.1
= control target key start
LH: loop header
LB: loop body
LE: loop exit
PB: predicated region body
PF: predicated region fallthrough
CT: control target
= control target key end

     0   :  { %12 = vsyncpa [#allocation3], 0  ;;  %vm113_vm0 = vcmask 130048   ;;  %v3148_v4 = vmov 0   ;;  %v2334_v6 = vmov 9   ;;  %s3141_s0 = inlined_call_operand.vmem [shape: f32[2,16,64], index: 0, kind: input, shape index: {}]   ;;  %s3142_s1 = inlined_call_operand.vmem [shape: f32[32,16], index: 1, kind: input, shape index: {}]   ;;  %s3143_s2 = inlined_call_operand.vmem [shape: f32[32,32], index: 2, kind: input, shape index: {}]   ;;  %s3144_s3 = inlined_call_operand.vmem [shape: f32[32,11], index: 3, kind: input, shape index: {}]   ;;  %s3145_s4 = inlined_call_operand.vmem [shape: f32[32,1], index: 4, kind: input, shape index: {}]   ;;  %s3146_s5 = inlined_call_operand.hbm [shape: f32[2,16,64], index: 5, kind: output, shape index: {0}]   ;;  %s3147_s6 = inlined_call_operand.hbm [shape: f32[2,16,64], index: 6, kind: output, shape index: {1}]  }
   0x1   :  { %v91_v0 = vld [vmem:[%s3141_s0] sm:$0xff]  ;;  %v92_v1 = vld [vmem:[%s3141_s0 + $0x8] sm:$0xff]  ;;  %2172 = vset.pattern.permute.xlu0 %v3148_v4  ;;  %2173 = vset.pattern.permute.xlu1 %v2334_v6 }
   0x2   :  { %v28_v2 = vld [vmem:[%s3142_s1] sm:$0xff]  ;;  %v2043_v3 = vpack.c.bf16 %v92_v1, %v91_v0 }
   0x3   :  { %1911 = vmatprep.mubr.msk.f32.mxu1 %vm113_vm0, %v28_v2  ;;  %v2399_v5 = vld [vmem:[%s3144_s3] sm:$0xff] }
   0x4   :  { %2044 = vmatprep.subr.bf16.mxu1 %v2043_v3  ;;  %95 = vperm.xlu0 %2172, %v2399_v5  }
   0x5   :  { %13 = vsyncpa [#allocation5], 0  ;;  %2046 = vmatpush3.bf16.msra.mxu1 %v2043_v3  ;;  %v29_v7 = vld [vmem:[%s3142_s1 + $0x8] sm:$0xff]  ;;  %216 = vperm.xlu1 %2173, %v2399_v5   ;;  %v30_v9 = vld [vmem:[%s3142_s1 + $0x10] sm:$0xff]  ;;  %vm3163_vm2 = vcmask 523264   ;;  %v3156_v49 = vmov 1  }
   0x6   :  { %v2408_v8 = vld [vmem:[%s3144_s3 + $0x8] sm:$0xff]  ;;  %v31_v10 = vld [vmem:[%s3142_s1 + $0x18] sm:$0xff]  ;;  %v2423_v11 = vld [vmem:[%s3144_s3 + $0x10] sm:$0xff]  ;;  %v2336_v50 = vmov 3   ;;  %s2337_s17 = smov 1   ;;  %s2347_s27 = smov [#allocation4]  }
   0x7   :  { %v2429_v12 = vld [vmem:[%s3144_s3 + $0x18] sm:$0xff] }
   0x8   :  { %1912 = vmatmul.mubr.msk.f32.vlgmr.msra.gmra.mrb[0].mxu1 %vm113_vm0, %v29_v7  ;;  %100 = vperm.xlu0 %2172, %v2408_v8  }
   0x9   :  { %1914 = vmatprep.mubr.msk.f32.mxu1 %vm113_vm0, %v30_v9  ;;  %220 = vperm.xlu1 %2173, %v2408_v8  }
   0xc   :  { %1915 = vmatmul.mubr.msk.f32.gmra.mrb[2].mxu1 %vm113_vm0, %v31_v10  ;;  %105 = vperm.xlu0 %2172, %v2423_v11  }
   0xd   :  { %2174 = vset.pattern.permute.xlu1 %v3148_v4 }
   0xe   :  { %110 = vperm.xlu1 %2174, %v2429_v12  }
  0x10   :  { %2175 = vset.pattern.permute.xlu0 %v2334_v6 }
  0x11   :  { %224 = vperm.xlu0 %2175, %v2423_v11  }
  0x12   :  { %2176 = vset.pattern.permute.xlu1 %v2334_v6 }
  0x13   :  { %228 = vperm.xlu1 %2176, %v2429_v12  }
  0x15   :  { %2178 = vset.pattern.permute.xlu0 %v2336_v50 }
  0x17   :  { %2177 = vset.pattern.permute.xlu1 %v3156_v49 }
  0x83   :  { %v2439_v14 = vpop.permute.xlu0 %95 }
  0x84   :  { %v2437_v13 = vpop.permute.xlu1 %216 }
  0x87   :  { %v2443_v16 = vpop.permute.xlu0 %100 }
  0x88   :  { %v2441_v15 = vpop.permute.xlu1 %220 }
  0x8b   :  { %v2447_v19 = vpop.permute.xlu0 %105 }
  0x8d   :  { %v2445_v17 = vpop.permute.xlu1 %110 }
  0x90   :  { %v2458_v30 = vpop.permute.xlu0 %224 }
  0x92   :  { %v2453_v26 = vpop.permute.xlu1 %228 }
  0xdb   :  { %v1913_v18 = vpop.f32.mrb[0].mxu1 }
  0xdc   :  { %v198_v20 = vadd.f32 %v1913_v18, %v2443_v16  ;;  %v192_v21 = vpop.f32.mrb[1].mxu1 }
  0xdd   :  { %v193_v22 = vadd.f32 %v192_v21, %v2439_v14 }
  0xde   :  { %v232_v23 = vmul.f32 %v2441_v15, %v198_v20  ;;  %vm212_vm1 = vcmp.ge.f32.partialorder %v198_v20, 0.0 }
  0xdf   :  { %v231_v24 = vmul.f32 %v2437_v13, %v193_v22  ;;  %v1916_v25 = vpop.f32.mrb[2].mxu1  ;;  %vm211_vm3 = vcmp.ge.f32.partialorder %v193_v22, 0.0 }
  0xe0   :  { %v202_v27 = vpop.f32.mrb[3].mxu1  ;;  %v208_v28 = vadd.f32 %v1916_v25, %v2445_v17  ;;  %v2456_v29 = vsel %vm212_vm1, %v198_v20, %v232_v23 }
  0xe1   :  { %v203_v31 = vadd.f32 %v202_v27, %v2447_v19  ;;  %v243_v32 = vsel %vm3163_vm2, %v2456_v29, 0.0  ;;  %v2463_v33 = vsel %vm211_vm3, %v193_v22, %v231_v24  ;;  %v253_v34 = vmul.f32 %v2456_v29, %v2456_v29 }
  0xe2   :  { %244 = vadd.xlane.f32.xlu0 %v243_v32  ;;  %v240_v35 = vsel %vm3163_vm2, %v2463_v33, 0.0  ;;  %v234_v36 = vmul.f32 %v2453_v26, %v208_v28  ;;  %v252_v37 = vmul.f32 %v2463_v33, %v2463_v33  ;;  %vm214_vm4 = vcmp.ge.f32.partialorder %v208_v28, 0.0 }
  0xe3   :  { %v233_v38 = vmul.f32 %v2458_v30, %v203_v31  ;;  %241 = vadd.xlane.f32.xlu1 %v240_v35  ;;  %vm213_vm5 = vcmp.ge.f32.partialorder %v203_v31, 0.0  ;;  %v259_v41 = vsel %vm3163_vm2, %v253_v34, 0.0 }
  0xe4   :  { %v256_v39 = vsel %vm3163_vm2, %v252_v37, 0.0  ;;  %v2474_v40 = vsel %vm214_vm4, %v208_v28, %v234_v36 }
  0xe5   :  { %v2477_v42 = vsel %vm213_vm5, %v203_v31, %v233_v38  ;;  %v249_v43 = vsel %vm3163_vm2, %v2474_v40, 0.0  ;;  %v255_v44 = vmul.f32 %v2474_v40, %v2474_v40 }
  0xe6   :  { %257 = vadd.xlane.f32.xlu0 %v256_v39  ;;  %v246_v45 = vsel %vm3163_vm2, %v2477_v42, 0.0  ;;  %v254_v46 = vmul.f32 %v2477_v42, %v2477_v42 }
  0xe7   :  { %260 = vadd.xlane.f32.xlu1 %v259_v41  ;;  %v265_v47 = vsel %vm3163_vm2, %v255_v44, 0.0 }
  0xe8   :  { %v262_v48 = vsel %vm3163_vm2, %v254_v46, 0.0 }
  0xea   :  { %247 = vadd.xlane.f32.xlu0 %v246_v45 }
  0xeb   :  { %250 = vadd.xlane.f32.xlu1 %v249_v43 }
  0xee   :  { %263 = vadd.xlane.f32.xlu0 %v262_v48 }
  0xef   :  { %266 = vadd.xlane.f32.xlu1 %v265_v47 }
 0x16f   :  { %v245_v51 = vpop.xlane.xlu0 %244 }
 0x170   :  { %v242_v52 = vpop.xlane.xlu1 %241  ;;  %v2491_v53 = vmul.f32 0.015625, %v245_v51 }
 0x171   :  { %v2493_v54 = vmul.f32 0.015625, %v242_v52 }
 0x172   :  { %v277_v59 = vmul.f32 %v2491_v53, %v2491_v53 }
 0x173   :  { %v276_v55 = vmul.f32 %v2493_v54, %v2493_v54  ;;  %v258_v56 = vpop.xlane.xlu0 %257 }
 0x174   :  { %v272_v57 = vmul.f32 0.015625, %v258_v56  ;;  %v261_v58 = vpop.xlane.xlu1 %260 }
 0x175   :  { %v273_v60 = vmul.f32 0.015625, %v261_v58 }
 0x176   :  { %v280_v61 = vsub.f32 %v272_v57, %v276_v55 }
 0x177   :  { %v281_v62 = vsub.f32 %v273_v60, %v277_v59  ;;  %v248_v63 = vpop.xlane.xlu0 %247 }
 0x178   :  { %v284_v0 = vmax.f32 %v280_v61, 0.0  ;;  %v2499_v1 = vmul.f32 0.015625, %v248_v63  ;;  %v251_v2 = vpop.xlane.xlu1 %250 }
 0x179   :  { %v285_v3 = vmax.f32 %v281_v62, 0.0  ;;  %v2501_v6 = vmul.f32 0.015625, %v251_v2 }
 0x17a   :  { %2213 = vrsqrt.f32 %v284_v0  ;;  %v278_v10 = vmul.f32 %v2499_v1, %v2499_v1  ;;  %vm290_vm6 = vcmp.eq.f32.partialorder %v284_v0, inf  ;;  %v293_v32 = vand.u32 2147483648, %v284_v0 }
 0x17b   :  { %2215 = vrsqrt.f32 %v285_v3  ;;  %v279_v7 = vmul.f32 %v2501_v6, %v2501_v6  ;;  %v264_v9 = vpop.xlane.xlu0 %263  ;;  %vm292_vm7 = vcmp.eq.f32.partialorder %v284_v0, 0.0  ;;  %vm297_vm8 = vcmp.eq.f32.partialorder %v285_v3, inf }
 0x17c   :  { %v274_v18 = vmul.f32 0.015625, %v264_v9  ;;  %v267_v20 = vpop.xlane.xlu1 %266  ;;  %v300_v36 = vand.u32 2147483648, %v285_v3  ;;  %vm299_vm9 = vcmp.eq.f32.partialorder %v285_v3, 0.0 }
 0x17d   :  { %v275_v21 = vmul.f32 0.015625, %v267_v20 }
 0x17e   :  { %v282_v22 = vsub.f32 %v274_v18, %v278_v10 }
 0x17f   :  { %v283_v23 = vsub.f32 %v275_v21, %v279_v7  ;;  %v40_v21 = vlaneseq }
 0x180   :  { %v286_v24 = vmax.f32 %v282_v22, 0.0 }
 0x181   :  { %v287_v25 = vmax.f32 %v283_v23, 0.0  ;;  %v41_v22 = vshrl.u32 %v40_v21, 7  ;;  %v50_v23 = vand.u32 127, %v40_v21 }
 0x182   :  { %2217 = vrsqrt.f32 %v286_v24  ;;  %vm304_vm10 = vcmp.eq.f32.partialorder %v286_v24, inf  ;;  %v307_v47 = vand.u32 2147483648, %v286_v24  ;;  %vm306_vm11 = vcmp.eq.f32.partialorder %v286_v24, 0.0 }
 0x183   :  { %2219 = vrsqrt.f32 %v287_v25  ;;  %vm311_vm12 = vcmp.eq.f32.partialorder %v287_v25, inf  ;;  %v314_v52 = vand.u32 2147483648, %v287_v25  ;;  %vm313_vm13 = vcmp.eq.f32.partialorder %v287_v25, 0.0 }
 0x184   :  { %v2214_v27 = vpop.eup %2213 }
 0x185   :  { %v2216_v28 = vpop.eup %2215  ;;  %v289_v31 = vmul.f32 %v2214_v27, %v284_v0  ;;  %v43_v27 = vadd.s32 16, %v41_v22 }
 0x186   :  { %v296_v34 = vmul.f32 %v2216_v28, %v285_v3  ;;  %v44_v28 = vadd.s32 24, %v41_v22 }
 0x187   :  { %v291_v35 = vsel %vm290_vm6, %v284_v0, %v289_v31 }
 0x188   :  { %v294_v37 = vsel %vm292_vm7, %v293_v32, %v291_v35  ;;  %v298_v38 = vsel %vm297_vm8, %v285_v3, %v296_v34  ;;  %v2534_v32 = vsub.s32 %v50_v23, %v43_v27  ;;  %v2536_v34 = vsub.s32 %v50_v23, %v44_v28 }
 0x189   :  { %v316_v39 = vadd.f32 1e-05, %v294_v37  ;;  %v301_v41 = vsel %vm299_vm9, %v300_v36, %v298_v38  ;;  %v3154_v36 = vmov 1.0|1.0   ;;  %v45_v38 = vadd.s32 32, %v41_v22 }
 0x18a   :  { %v317_v43 = vadd.f32 1e-05, %v301_v41  ;;  %vm61_vm1 = vcmp.eq.s32.totalorder %v2534_v32, 2  ;;  %vm62_vm3 = vcmp.eq.s32.totalorder %v2536_v34, 2 }
 0x18b   :  { %2221 = vrcp.f32 %v316_v39  ;;  %vm2547_vm5 = vmpackc.low %vm62_vm3, %vm61_vm1  ;;  %v46_v39 = vadd.s32 40, %v41_v22 }
 0x18c   :  { %v2218_v44 = vpop.eup %2217  ;;  %2223 = vrcp.f32 %v317_v43 }
 0x18d   :  { %v2220_v45 = vpop.eup %2219  ;;  %v303_v46 = vmul.f32 %v2218_v44, %v286_v24  ;;  %v55_v44 = vsub.s32 %v50_v23, %v45_v38 }
 0x18e   :  { %v310_v48 = vmul.f32 %v2220_v45, %v287_v25  ;;  %v56_v45 = vsub.s32 %v50_v23, %v46_v39 }
 0x18f   :  { %v305_v51 = vsel %vm304_vm10, %v286_v24, %v303_v46  ;;  %v42_v24 = vadd.s32 8, %v41_v22  ;;  %vm63_vm6 = vcmp.eq.s32.totalorder %v55_v44, 2 }
 0x190   :  { %v308_v55 = vsel %vm306_vm11, %v307_v47, %v305_v51  ;;  %v312_v56 = vsel %vm311_vm12, %v287_v25, %v310_v48  ;;  %v51_v25 = vsub.s32 %v50_v23, %v41_v22  ;;  %vm64_vm7 = vcmp.eq.s32.totalorder %v56_v45, 2 }
 0x191   :  { %v318_v57 = vadd.f32 1e-05, %v308_v55  ;;  %v315_v58 = vsel %vm313_vm13, %v314_v52, %v312_v56  ;;  %v52_v31 = vsub.s32 %v50_v23, %v42_v24  ;;  %v47_v47 = vadd.s32 48, %v41_v22  ;;  %vm2561_vm8 = vmpackc.low %vm64_vm7, %vm63_vm6 }
 0x192   :  { %v319_v59 = vadd.f32 1e-05, %v315_v58  ;;  %vm59_vm14 = vcmp.eq.s32.totalorder %v51_v25, 2  ;;  %v48_v48 = vadd.s32 56, %v41_v22  ;;  %vm75_vm12 = vcmp.eq.s32.totalorder %v51_v25, 4294967294 }
 0x193   :  { %2225 = vrcp.f32 %v318_v57  ;;  %vm60_vm15 = vcmp.eq.s32.totalorder %v52_v31, 2  ;;  %v57_v55 = vsub.s32 %v50_v23, %v47_v47  ;;  %vm76_vm13 = vcmp.eq.s32.totalorder %v52_v31, 4294967294 }
 0x194   :  { %2227 = vrcp.f32 %v319_v59  ;;  %vm2540_vm4 = vmpackc.low %vm60_vm15, %vm59_vm14  ;;  %v58_v56 = vsub.s32 %v50_v23, %v48_v48  ;;  %vm79_vm15 = vcmp.eq.s32.totalorder %v55_v44, 4294967294  ;;  %vm80_vm1 = vcmp.eq.s32.totalorder %v56_v45, 4294967294 }
 0x195   :  { %v2222_v60 = vpop.eup %2221  ;;  %2048 = vmatprep.subr.msk.bf16.mxu1 %vm2540_vm4, %v3154_v36  ;;  %vm65_vm9 = vcmp.eq.s32.totalorder %v57_v55, 2  ;;  %vm2584_vm14 = vmpackc.low %vm76_vm13, %vm75_vm12  ;;  %vm81_vm6 = vcmp.eq.s32.totalorder %v57_v55, 4294967294  ;;  %vm78_vm12 = vcmp.eq.s32.totalorder %v2536_v34, 4294967294 }
 0x196   :  { %v2224_v61 = vpop.eup %2223  ;;  %v324_v62 = vmul.f32 %v2222_v60, %v2399_v5  ;;  %2050 = vmatpush3.bf16.msk.msra.mxu1 %vm2540_vm4, %v3154_v36  ;;  %vm66_vm10 = vcmp.eq.s32.totalorder %v58_v56, 2  ;;  %vm2594_vm3 = vmpackc.low %vm80_vm1, %vm79_vm15  ;;  %vm82_vm7 = vcmp.eq.s32.totalorder %v58_v56, 4294967294 }
 0x197   :  { %v325_v63 = vmul.f32 %v2224_v61, %v2408_v8  ;;  %2052 = vmatprep.subr.msk.bf16.mxu1 %vm2547_vm5, %v3154_v36  ;;  %vm2572_vm11 = vmpackc.low %vm66_vm10, %vm65_vm9  ;;  %vm77_vm10 = vcmp.eq.s32.totalorder %v2534_v32, 4294967294 }
 0x198   :  { %v328_v0 = vmul.f32 %v324_v62, %v2493_v54  ;;  %v2339_v54 = vmov 5   ;;  %vm2600_vm9 = vmpackc.low %vm82_vm7, %vm81_vm6 }
 0x199   :  { %v329_v2 = vmul.f32 %v325_v63, %v2491_v53  ;;  %v3152_v53 = vmov 2   ;;  %vm2632_vm13 = vmpackc.low %vm78_vm12, %vm77_vm10 }
 0x19a   :  { %336 = vrot.lane.b32.xlu0 %v328_v0, %s2337_s17  ;;  %2054 = vmatpush3.bf16.msk.msra.mxu1 %vm2547_vm5, %v3154_v36  ;;  %v2343_v0 = vmov 10  }
 0x19b   :  { %338 = vrot.lane.b32.xlu1 %v329_v2, %s2337_s17  ;;  %2056 = vmatprep.subr.msk.bf16.mxu1 %vm2561_vm8, %v3154_v36 }
 0x19d   :  { %v2226_v3 = vpop.eup %2225 }
 0x19e   :  { %v2228_v7 = vpop.eup %2227  ;;  %v326_v9 = vmul.f32 %v2226_v3, %v2423_v11  ;;  %2058 = vmatpush3.bf16.msk.msra.mxu1 %vm2561_vm8, %v3154_v36 }
 0x19f   :  { %v327_v10 = vmul.f32 %v2228_v7, %v2429_v12  ;;  %2060 = vmatprep.subr.msk.bf16.mxu1 %vm2572_vm11, %v3154_v36 }
 0x1a0   :  { %v330_v18 = vmul.f32 %v326_v9, %v2499_v1  ;;  %v2340_v1 = vmov 4  }
 0x1a1   :  { %v331_v20 = vmul.f32 %v327_v10, %v2501_v6  ;;  %v2341_v6 = vmov 6  }
 0x1a2   :  { %340 = vrot.lane.b32.xlu1 %v330_v18, %s2337_s17  ;;  %2062 = vmatpush3.bf16.msk.msra.mxu1 %vm2572_vm11, %v3154_v36 }
 0x1a3   :  { %342 = vrot.lane.b32.xlu0 %v331_v20, %s2337_s17  ;;  %2064 = vmatprep.subr.msk.bf16.mxu1 %vm2584_vm14, %v3154_v36 }
 0x1a6   :  { %354 = vperm.xlu1 %2177, %v324_v62  }
 0x1a7   :  { %401 = vperm.xlu0 %2178, %v2399_v5  }
 0x1aa   :  { %2180 = vset.pattern.permute.xlu1 %v2336_v50 }
 0x1ab   :  { %2179 = vset.pattern.permute.xlu0 %v3156_v49  ;;  %405 = vperm.xlu1 %2180, %v2408_v8  }
 0x1ac   :  { %359 = vperm.xlu0 %2179, %v325_v63  }
 0x1af   :  { %2181 = vset.pattern.permute.xlu1 %v3156_v49 }
 0x1b0   :  { %369 = vperm.xlu0 %2179, %v327_v10   ;;  %364 = vperm.xlu1 %2181, %v326_v9  }
 0x1b4   :  { %2182 = vset.pattern.permute.xlu0 %v2336_v50  ;;  %2183 = vset.pattern.permute.xlu1 %v3152_v53 }
 0x1b5   :  { %409 = vperm.xlu0 %2182, %v2423_v11  }
 0x1b9   :  { %2187 = vset.pattern.permute.xlu0 %v2339_v54 }
 0x1ba   :  { %566 = vperm.xlu0 %2187, %v2408_v8  }
 0x1be   :  { %2188 = vset.pattern.permute.xlu0 %v2340_v1 }
 0x1bf   :  { %538 = vperm.xlu0 %2188, %v2399_v5  }
 0x1c3   :  { %2191 = vset.pattern.permute.xlu0 %v2341_v6 }
 0x1c4   :  { %522 = vperm.xlu0 %2191, %v2408_v8  }
 0x1c8   :  { %526 = vperm.xlu0 %2191, %v2423_v11  }
 0x1cc   :  { %2194 = vset.pattern.permute.xlu0 %v2343_v0 }
 0x1cd   :  { %687 = vperm.xlu0 %2194, %v2399_v5  }
 0x1d1   :  { %699 = vperm.xlu0 %2194, %v2429_v12  }
 0x20c   :  { %v337_v46 = vpop.permute.xlu0 %336 }
 0x20d   :  { %v339_v41 = vpop.permute.xlu1 %338  ;;  %v348_v52 = vsub.f32 %v2399_v5, %v337_v46 }
 0x20e   :  { %v349_v43 = vsub.f32 %v2408_v8, %v339_v41 }
 0x210   :  { %383 = vperm.xlu1 %2183, %v349_v43  }
 0x214   :  { %378 = vperm.xlu1 %2183, %v348_v52   ;;  %v341_v61 = vpop.permute.xlu1 %340 }
 0x215   :  { %v343_v58 = vpop.permute.xlu0 %342 }
 0x216   :  { %v351_v60 = vsub.f32 %v2429_v12, %v343_v58 }
 0x218   :  { %2184 = vset.pattern.permute.xlu1 %v2336_v50  ;;  %v350_v50 = vsub.f32 %v2423_v11, %v341_v61 }
 0x219   :  { %413 = vperm.xlu1 %2184, %v2429_v12  }
 0x21d   :  { %2185 = vset.pattern.permute.xlu1 %v3152_v53 }
 0x21e   :  { %393 = vperm.xlu1 %2185, %v351_v60  }
 0x222   :  { %388 = vperm.xlu1 %2185, %v350_v50  }
 0x225   :  { %v355_v2 = vpop.permute.xlu1 %354 }
 0x226   :  { %2186 = vset.pattern.permute.xlu1 %v2339_v54  ;;  %v2621_v7 = vpop.permute.xlu0 %401  ;;  %v372_v54 = vmul.f32 %v355_v2, %v2463_v33 }
 0x227   :  { %562 = vperm.xlu1 %2186, %v2399_v5  }
 0x22a   :  { %v2619_v3 = vpop.permute.xlu1 %405 }
 0x22b   :  { %570 = vperm.xlu1 %2186, %v2423_v11   ;;  %v360_v10 = vpop.permute.xlu0 %359 }
 0x22c   :  { %v373_v20 = vmul.f32 %v360_v10, %v2456_v29 }
 0x22f   :  { %574 = vperm.xlu1 %2186, %v2429_v12   ;;  %v365_v9 = vpop.permute.xlu1 %364  ;;  %v370_v29 = vpop.permute.xlu0 %369 }
 0x230   :  { %v375_v27 = vmul.f32 %v370_v29, %v2474_v40  ;;  %v374_v28 = vmul.f32 %v365_v9, %v2477_v42 }
 0x233   :  { %2189 = vset.pattern.permute.xlu1 %v2340_v1 }
 0x234   :  { %542 = vperm.xlu1 %2189, %v2408_v8   ;;  %v2651_v31 = vpop.permute.xlu0 %409 }
 0x238   :  { %2190 = vset.pattern.permute.xlu1 %v2341_v6 }
 0x239   :  { %518 = vperm.xlu1 %2190, %v2399_v5   ;;  %v2661_v41 = vpop.permute.xlu0 %566 }
 0x23d   :  { %2192 = vset.pattern.permute.xlu1 %v2340_v1 }
 0x23e   :  { %546 = vperm.xlu1 %2192, %v2423_v11   ;;  %v2688_v58 = vpop.permute.xlu0 %538 }
 0x242   :  { %550 = vperm.xlu1 %2192, %v2429_v12  }
 0x243   :  { %v2692_v61 = vpop.permute.xlu0 %522 }
 0x246   :  { %2193 = vset.pattern.permute.xlu1 %v2341_v6 }
 0x247   :  { %530 = vperm.xlu1 %2193, %v2429_v12   ;;  %v2696_v2 = vpop.permute.xlu0 %526 }
 0x248   :  { %3180 = vst [vmem:[#allocation8_spill] sm:$0xff] %v2696_v2 }
 0x24b   :  { %2195 = vset.pattern.permute.xlu1 %v2343_v0 }
 0x24c   :  { %691 = vperm.xlu1 %2195, %v2408_v8   ;;  %v2705_v29 = vpop.permute.xlu0 %687 }
 0x24d   :  { %3182 = vst [vmem:[#allocation10_spill] sm:$0xff] %v2705_v29 }
 0x250   :  { %695 = vperm.xlu1 %2195, %v2423_v11  }
 0x28f   :  { %v384_v18 = vpop.permute.xlu1 %383 }
 0x290   :  { %v397_v1 = vadd.f32 %v384_v18, %v373_v20 }
 0x292   :  { %v417_v23 = vmul.f32 %v2619_v3, %v397_v1  ;;  %v578_v44 = vmul.f32 %v2661_v41, %v397_v1 }
 0x293   :  { %v379_v6 = vpop.permute.xlu1 %378 }
 0x294   :  { %v396_v21 = vadd.f32 %v379_v6, %v372_v54 }
 0x296   :  { %v416_v22 = vmul.f32 %v2621_v7, %v396_v21  ;;  %v553_v0 = vmul.f32 %v2688_v58, %v396_v21 }
 0x298   :  { %v2629_v24 = vpop.permute.xlu1 %413  ;;  %1933 = vmatprep.mubr.msk.f32.mxu1 %vm3163_vm2, %v416_v22 }
 0x299   :  { %1934 = vmatmul.mubr.msk.f32.vlgmr.msra.gmra.mrb[4].mxu1 %vm3163_vm2, %v417_v23 }
 0x29a   :  { %2066 = vmatpush3.bf16.msk.msra.mxu1 %vm2584_vm14, %v3154_v36 }
 0x29b   :  { %2068 = vmatprep.subr.msk.bf16.mxu1 %vm2632_vm13, %v3154_v36 }
 0x29d   :  { %v394_v33 = vpop.permute.xlu1 %393 }
 0x29e   :  { %2070 = vmatpush3.bf16.msk.msra.mxu1 %vm2632_vm13, %v3154_v36  ;;  %v399_v32 = vadd.f32 %v394_v33, %v375_v27 }
 0x29f   :  { %2072 = vmatprep.subr.msk.bf16.mxu1 %vm2594_vm3, %v3154_v36 }
 0x2a0   :  { %v419_v39 = vmul.f32 %v2629_v24, %v399_v32 }
 0x2a1   :  { %v389_v34 = vpop.permute.xlu1 %388 }
 0x2a2   :  { %v398_v38 = vadd.f32 %v389_v34, %v374_v28  ;;  %2074 = vmatpush3.bf16.msk.msra.mxu1 %vm2594_vm3, %v3154_v36 }
 0x2a3   :  { %2076 = vmatprep.subr.msk.bf16.mxu1 %vm2600_vm9, %v3154_v36 }
 0x2a4   :  { %v418_v40 = vmul.f32 %v2651_v31, %v398_v38 }
 0x2a6   :  { %v2663_v42 = vpop.permute.xlu1 %562  ;;  %1936 = vmatprep.mubr.msk.f32.mxu1 %vm3163_vm2, %v418_v40  ;;  %2078 = vmatpush3.bf16.msk.msra.mxu1 %vm2600_vm9, %v3154_v36 }
 0x2a7   :  { %v577_v43 = vmul.f32 %v2663_v42, %v396_v21  ;;  %1937 = vmatmul.mubr.msk.f32.gmra.mrb[6].mxu1 %vm3163_vm2, %v419_v39 }
 0x2a9   :  { %1955 = vmatprep.mubr.msk.f32.mxu1 %vm3163_vm2, %v577_v43 }
 0x2aa   :  { %v2673_v45 = vpop.permute.xlu1 %570 }
 0x2ab   :  { %v579_v46 = vmul.f32 %v2673_v45, %v398_v38  ;;  %1956 = vmatmul.mubr.msk.f32.vlgmr.msra.gmra.mrb[4].mxu1 %vm3163_vm2, %v578_v44 }
 0x2ad   :  { %1958 = vmatprep.mubr.msk.f32.mxu1 %vm3163_vm2, %v579_v46 }
 0x2ae   :  { %v2678_v47 = vpop.permute.xlu1 %574 }
 0x2af   :  { %v580_v48 = vmul.f32 %v2678_v47, %v399_v32 }
 0x2b1   :  { %1959 = vmatmul.mubr.msk.f32.gmra.mrb[6].mxu1 %vm3163_vm2, %v580_v48 }
 0x2b3   :  { %v2682_v52 = vpop.permute.xlu1 %542 }
 0x2b4   :  { %v554_v50 = vmul.f32 %v2682_v52, %v397_v1 }
 0x2b6   :  { %v2131_v10 = vadd.f32 %v554_v50, %v2692_v61 }
 0x2b8   :  { %v2684_v55 = vpop.permute.xlu1 %518 }
 0x2b9   :  { %v2133_v18 = vadd.f32 %v553_v0, %v2684_v55  ;;  %v2724_v0 = vpop.permute.xlu0 %699 }
 0x2ba   :  { %3183 = vst [vmem:[#allocation11_spill] sm:$0xff] %v2724_v0 }
 0x2bd   :  { %v2686_v56 = vpop.permute.xlu1 %546 }
 0x2be   :  { %v555_v22 = vmul.f32 %v2686_v56, %v398_v38 }
 0x2c0   :  { %v2137_v40 = vadd.f32 %v555_v22, %v2696_v2 }
 0x2c1   :  { %v2690_v60 = vpop.permute.xlu1 %550 }
 0x2c2   :  { %v556_v21 = vmul.f32 %v2690_v60, %v399_v32 }
 0x2c6   :  { %v2698_v9 = vpop.permute.xlu1 %530 }
 0x2c7   :  { %3181 = vst [vmem:[#allocation9_spill] sm:$0xff] %v2698_v9  ;;  %v2135_v28 = vadd.f32 %v556_v21, %v2698_v9 }
 0x2cb   :  { %v2703_v23 = vpop.permute.xlu1 %691 }
 0x37e   :  { %v1957_v20 = vpop.f32.mrb[4].mxu1 }
 0x37f   :  { %v2132_v54 = vadd.f32 %v2131_v10, %v1957_v20  ;;  %v659_v6 = vpop.f32.mrb[5].mxu1 }
 0x380   :  { %v2134_v1 = vadd.f32 %v2133_v18, %v659_v6  ;;  %v2726_v18 = vpop.permute.xlu1 %695 }
 0x381   :  { %v703_v33 = vmul.f32 %v2132_v54, %v2703_v23  ;;  %vm683_vm15 = vcmp.ge.f32.partialorder %v2132_v54, 0.0  ;;  %3184 = vst [vmem:[#allocation12_spill] sm:$0xff] %v2726_v18 }
 0x382   :  { %v702_v27 = vmul.f32 %v2134_v1, %v2705_v29  ;;  %vm682_vm1 = vcmp.ge.f32.partialorder %v2134_v1, 0.0 }
 0x383   :  { %v2711_v34 = vsel %vm683_vm15, %v2132_v54, %v703_v33 }
 0x384   :  { %v1960_v38 = vpop.f32.mrb[6].mxu1  ;;  %v713_v39 = vsel %vm3163_vm2, %v2711_v34, 0.0  ;;  %v2716_v43 = vsel %vm682_vm1, %v2134_v1, %v702_v27  ;;  %v723_v50 = vmul.f32 %v2711_v34, %v2711_v34 }
 0x385   :  { %v2136_v44 = vadd.f32 %v2135_v28, %v1960_v38  ;;  %v669_v32 = vpop.f32.mrb[7].mxu1  ;;  %714 = vadd.xlane.f32.xlu0 %v713_v39  ;;  %v710_v46 = vsel %vm3163_vm2, %v2716_v43, 0.0  ;;  %v722_v48 = vmul.f32 %v2716_v43, %v2716_v43 }
 0x386   :  { %v2138_v10 = vadd.f32 %v2137_v40, %v669_v32  ;;  %711 = vadd.xlane.f32.xlu1 %v710_v46  ;;  %v729_v22 = vsel %vm3163_vm2, %v723_v50, 0.0 }
 0x387   :  { %v705_v20 = vmul.f32 %v2136_v44, %v2724_v0  ;;  %v726_v54 = vsel %vm3163_vm2, %v722_v48, 0.0  ;;  %vm685_vm6 = vcmp.ge.f32.partialorder %v2136_v44, 0.0 }
 0x388   :  { %v704_v6 = vmul.f32 %v2138_v10, %v2726_v18  ;;  %vm684_vm7 = vcmp.ge.f32.partialorder %v2138_v10, 0.0 }
 0x389   :  { %727 = vadd.xlane.f32.xlu0 %v726_v54  ;;  %v2734_v21 = vsel %vm685_vm6, %v2136_v44, %v705_v20  ;;  %v3150_v44 = vmov 7  }
 0x38a   :  { %730 = vadd.xlane.f32.xlu1 %v729_v22  ;;  %v2732_v1 = vsel %vm684_vm7, %v2138_v10, %v704_v6  ;;  %v719_v28 = vsel %vm3163_vm2, %v2734_v21, 0.0  ;;  %v725_v40 = vmul.f32 %v2734_v21, %v2734_v21  ;;  %2197 = vset.pattern.permute.xlu0 %v3150_v44 }
 0x38b   :  { %v716_v33 = vsel %vm3163_vm2, %v2732_v1, 0.0  ;;  %v724_v27 = vmul.f32 %v2732_v1, %v2732_v1  ;;  %2196 = vset.pattern.permute.xlu1 %v3150_v44 }
 0x38c   :  { %v735_v39 = vsel %vm3163_vm2, %v725_v40, 0.0 }
 0x38d   :  { %717 = vadd.xlane.f32.xlu0 %v716_v33  ;;  %v732_v38 = vsel %vm3163_vm2, %v724_v27, 0.0 }
 0x38e   :  { %720 = vadd.xlane.f32.xlu1 %v719_v28 }
 0x391   :  { %733 = vadd.xlane.f32.xlu0 %v732_v38 }
 0x392   :  { %736 = vadd.xlane.f32.xlu1 %v735_v39 }
 0x412   :  { %v715_v32 = vpop.xlane.xlu0 %714 }
 0x413   :  { %v712_v46 = vpop.xlane.xlu1 %711  ;;  %v2748_v48 = vmul.f32 0.015625, %v715_v32 }
 0x414   :  { %v2750_v50 = vmul.f32 0.015625, %v712_v46 }
 0x415   :  { %v747_v22 = vmul.f32 %v2748_v48, %v2748_v48 }
 0x416   :  { %v746_v10 = vmul.f32 %v2750_v50, %v2750_v50  ;;  %v728_v20 = vpop.xlane.xlu0 %727 }
 0x417   :  { %v742_v54 = vmul.f32 0.015625, %v728_v20  ;;  %v731_v6 = vpop.xlane.xlu1 %730 }
 0x418   :  { %v743_v33 = vmul.f32 0.015625, %v731_v6 }
 0x419   :  { %v750_v27 = vsub.f32 %v742_v54, %v746_v10 }
 0x41a   :  { %v751_v28 = vsub.f32 %v743_v33, %v747_v22  ;;  %v718_v40 = vpop.xlane.xlu0 %717 }
 0x41b   :  { %v754_v38 = vmax.f32 %v750_v27, 0.0  ;;  %v2756_v39 = vmul.f32 0.015625, %v718_v40  ;;  %v721_v32 = vpop.xlane.xlu1 %720 }
 0x41c   :  { %v755_v4 = vmax.f32 %v751_v28, 0.0  ;;  %v2758_v46 = vmul.f32 0.015625, %v721_v32 }
 0x41d   :  { %2229 = vrsqrt.f32 %v754_v38  ;;  %v748_v20 = vmul.f32 %v2756_v39, %v2756_v39  ;;  %vm760_vm10 = vcmp.eq.f32.partialorder %v754_v38, inf  ;;  %v763_v49 = vand.u32 2147483648, %v754_v38 }
 0x41e   :  { %2231 = vrsqrt.f32 %v755_v4  ;;  %v734_v44 = vpop.xlane.xlu0 %733  ;;  %v749_v10 = vmul.f32 %v2758_v46, %v2758_v46  ;;  %vm767_vm12 = vcmp.eq.f32.partialorder %v755_v4, inf  ;;  %v770_v0 = vand.u32 2147483648, %v755_v4 }
 0x41f   :  { %v744_v53 = vmul.f32 0.015625, %v734_v44  ;;  %v737_v36 = vpop.xlane.xlu1 %736  ;;  %vm762_vm15 = vcmp.eq.f32.partialorder %v754_v38, 0.0  ;;  %vm769_vm1 = vcmp.eq.f32.partialorder %v755_v4, 0.0 }
 0x420   :  { %v745_v54 = vmul.f32 0.015625, %v737_v36 }
 0x421   :  { %v752_v6 = vsub.f32 %v744_v53, %v748_v20 }
 0x422   :  { %v753_v22 = vsub.f32 %v745_v54, %v749_v10 }
 0x423   :  { %v756_v33 = vmax.f32 %v752_v6, 0.0 }
 0x424   :  { %v757_v27 = vmax.f32 %v753_v22, 0.0 }
 0x425   :  { %2233 = vrsqrt.f32 %v756_v33  ;;  %vm774_vm6 = vcmp.eq.f32.partialorder %v756_v33, inf  ;;  %v777_v22 = vand.u32 2147483648, %v756_v33  ;;  %vm776_vm2 = vcmp.eq.f32.partialorder %v756_v33, 0.0 }
 0x426   :  { %2235 = vrsqrt.f32 %v757_v27  ;;  %vm781_vm7 = vcmp.eq.f32.partialorder %v757_v27, inf }
 0x427   :  { %v2230_v28 = vpop.eup %2229 }
 0x428   :  { %v2232_v40 = vpop.eup %2231  ;;  %v759_v32 = vmul.f32 %v2230_v28, %v754_v38 }
 0x429   :  { %v766_v18 = vmul.f32 %v2232_v40, %v755_v4  ;;  %v784_v40 = vand.u32 2147483648, %v757_v27 }
 0x42a   :  { %v761_v44 = vsel %vm760_vm10, %v754_v38, %v759_v32  ;;  %vm783_vm10 = vcmp.eq.f32.partialorder %v757_v27, 0.0 }
 0x42b   :  { %v764_v2 = vsel %vm762_vm15, %v763_v49, %v761_v44  ;;  %v768_v29 = vsel %vm767_vm12, %v755_v4, %v766_v18 }
 0x42c   :  { %v786_v36 = vadd.f32 1e-05, %v764_v2  ;;  %v771_v53 = vsel %vm769_vm1, %v770_v0, %v768_v29 }
 0x42d   :  { %v787_v20 = vadd.f32 1e-05, %v771_v53 }
 0x42e   :  { %2237 = vrcp.f32 %v786_v36 }
 0x42f   :  { %v2234_v10 = vpop.eup %2233  ;;  %2239 = vrcp.f32 %v787_v20 }
 0x430   :  { %v2236_v54 = vpop.eup %2235  ;;  %v773_v6 = vmul.f32 %v2234_v10, %v756_v33 }
 0x431   :  { %v780_v28 = vmul.f32 %v2236_v54, %v757_v27 }
 0x432   :  { %v775_v9 = vsel %vm774_vm6, %v756_v33, %v773_v6 }
 0x433   :  { %v778_v32 = vsel %vm776_vm2, %v777_v22, %v775_v9  ;;  %v782_v38 = vsel %vm781_vm7, %v757_v27, %v780_v28  ;;  %vm890_vm2 = vcmask 261120  }
 0x434   :  { %v788_v49 = vadd.f32 1e-05, %v778_v32  ;;  %v785_v4 = vsel %vm783_vm10, %v784_v40, %v782_v38  ;;  %v3185_v38 = vmov 1  }
 0x435   :  { %v789_v2 = vadd.f32 1e-05, %v785_v4 }
 0x436   :  { %2241 = vrcp.f32 %v788_v49 }
 0x437   :  { %2243 = vrcp.f32 %v789_v2 }
 0x438   :  { %v2238_v29 = vpop.eup %2237 }
 0x439   :  { %v2240_v0 = vpop.eup %2239  ;;  %v794_v18 = vmul.f32 %v2238_v29, %v2399_v5 }
 0x43a   :  { %v795_v44 = vmul.f32 %v2240_v0, %v2408_v8 }
 0x43b   :  { %v798_v36 = vmul.f32 %v794_v18, %v2750_v50 }
 0x43c   :  { %v799_v53 = vmul.f32 %v795_v44, %v2748_v48  ;;  %v2345_v48 = vmov 8  }
 0x43d   :  { %806 = vrot.lane.b32.xlu0 %v798_v36, %s2337_s17 }
 0x43e   :  { %808 = vrot.lane.b32.xlu1 %v799_v53, %s2337_s17 }
 0x440   :  { %v2242_v9 = vpop.eup %2241 }
 0x441   :  { %v2244_v33 = vpop.eup %2243  ;;  %v796_v27 = vmul.f32 %v2242_v9, %v2423_v11 }
 0x442   :  { %v797_v20 = vmul.f32 %v2244_v33, %v2429_v12 }
 0x443   :  { %v800_v10 = vmul.f32 %v796_v27, %v2756_v39 }
 0x444   :  { %v801_v54 = vmul.f32 %v797_v20, %v2758_v46 }
 0x445   :  { %810 = vrot.lane.b32.xlu1 %v800_v10, %s2337_s17  ;;  %v1797_v10 = vld [vmem:[%s3141_s0 + $0x10] sm:$0xff] }
 0x446   :  { %812 = vrot.lane.b32.xlu0 %v801_v54, %s2337_s17 }
 0x449   :  { %824 = vperm.xlu1 %2196, %v794_v18  }
 0x44a   :  { %829 = vperm.xlu0 %2197, %v795_v44  }
 0x44d   :  { %839 = vperm.xlu1 %2196, %v797_v20  }
 0x44e   :  { %834 = vperm.xlu0 %2197, %v796_v27  }
 0x451   :  { %2198 = vset.pattern.permute.xlu1 %v2345_v48 }
 0x452   :  { %2199 = vset.pattern.permute.xlu0 %v2345_v48 }
 0x4af   :  { %v807_v22 = vpop.permute.xlu0 %806 }
 0x4b0   :  { %v809_v50 = vpop.permute.xlu1 %808  ;;  %v818_v39 = vsub.f32 %v2399_v5, %v807_v22  ;;  %v3186_v22 = vmov 1.0|1.0  }
 0x4b1   :  { %v819_v6 = vsub.f32 %v2408_v8, %v809_v50  ;;  %v32_v8 = vld [vmem:[%s3143_s2] sm:$0xff] }
 0x4b2   :  { %1969 = vmatprep.mubr.msk.f32.mxu0 %vm890_vm2, %v32_v8  ;;  %2037 = vmatprep.mubr.msk.f32.mxu1 %vm890_vm2, %v32_v8 }
 0x4b3   :  { %853 = vperm.xlu1 %2198, %v819_v6   ;;  %v2816_v6 = vld [vmem:[%s3143_s2 + $0x18] sm:$0xff] }
 0x4b7   :  { %v811_v46 = vpop.permute.xlu1 %810  ;;  %848 = vperm.xlu1 %2198, %v818_v39   ;;  %v2277_v39 = vld [vmem:[%s3142_s1] sm:$0xff] }
 0x4b8   :  { %v820_v28 = vsub.f32 %v2423_v11, %v811_v46  ;;  %v813_v40 = vpop.permute.xlu0 %812  ;;  %v2278_v46 = vld [vmem:[%s3142_s1 + $0x8] sm:$0xff] }
 0x4b9   :  { %v821_v32 = vsub.f32 %v2429_v12, %v813_v40  ;;  %v2280_v40 = vld [vmem:[%s3142_s1 + $0x18] sm:$0xff] }
 0x4ba   :  { %858 = vperm.xlu0 %2199, %v820_v28   ;;  %v2279_v28 = vld [vmem:[%s3142_s1 + $0x10] sm:$0xff] }
 0x4bb   :  { %863 = vperm.xlu1 %2198, %v821_v32  }
 0x4be   :  { %2201 = vset.pattern.permute.xlu0 %v3185_v38 }
 0x4bf   :  { %2200 = vset.pattern.permute.xlu1 %v3185_v38 }
 0x4c8   :  { %v825_v5 = vpop.permute.xlu1 %824 }
 0x4c9   :  { %v830_v49 = vpop.permute.xlu0 %829  ;;  %v842_v12 = vmul.f32 %v825_v5, %v2716_v43 }
 0x4ca   :  { %v843_v2 = vmul.f32 %v830_v49, %v2711_v34  ;;  %v1798_v34 = vld [vmem:[%s3141_s0 + $0x18] sm:$0xff]  ;;  %s1750_s0 = sshll.u32 %s2347_s27, 4  ;;  %s1751_s0 = int_to_ptr.vmem [resolvable:$true] %s1750_s0 }
 0x4cb   :  { %v2087_v50 = vpack.c.bf16 %v1798_v34, %v1797_v10 }
 0x4cc   :  { %v840_v11 = vpop.permute.xlu1 %839 }
 0x4cd   :  { %v835_v29 = vpop.permute.xlu0 %834  ;;  %v845_v53 = vmul.f32 %v840_v11, %v2734_v21  ;;  %v2807_v21 = vld [vmem:[%s3143_s2 + $0x10] sm:$0xff] }
 0x4ce   :  { %v844_v36 = vmul.f32 %v835_v29, %v2732_v1  ;;  %v2802_v1 = vld [vmem:[%s3143_s2 + $0x8] sm:$0xff] }
 0x532   :  { %v854_v4 = vpop.permute.xlu1 %853 }
 0x533   :  { %v867_v18 = vadd.f32 %v854_v4, %v843_v2 }
 0x536   :  { %v849_v0 = vpop.permute.xlu1 %848 }
 0x537   :  { %v866_v44 = vadd.f32 %v849_v0, %v842_v12 }
 0x539   :  { %v859_v9 = vpop.permute.xlu0 %858  ;;  %v2079_v33 = vpack.c.bf16 %v867_v18, %v866_v44 }
 0x53a   :  { %v868_v27 = vadd.f32 %v859_v9, %v844_v36  ;;  %v864_v20 = vpop.permute.xlu1 %863 }
 0x53b   :  { %v869_v43 = vadd.f32 %v864_v20, %v845_v53  ;;  %2080 = vmatprep.subr.bf16.mxu0 %v2079_v33 }
 0x53c   :  { %2082 = vmatpush3.bf16.msra.mxu0 %v2079_v33 }
 0x53d   :  { %v2083_v54 = vpack.c.bf16 %v869_v43, %v868_v27 }
 0x53f   :  { %2084 = vmatprep.subr.bf16.mxu0 %v2083_v54 }
 0x540   :  { %2086 = vmatpush3.bf16.msra.mxu0 %v2083_v54 }
 0x541   :  { %2088 = vmatprep.subr.bf16.mxu0 %v2087_v50 }
 0x543   :  { %1970 = vmatmul.mubr.msk.f32.vlgmr.msra.gmra.mrb[0].mxu0 %vm890_vm2, %v2802_v1 }
 0x544   :  { %2090 = vmatpush3.bf16.msra.mxu0 %v2087_v50  ;;  %1972 = vmatprep.mubr.msk.f32.mxu0 %vm890_vm2, %v2807_v21 }
 0x545   :  { %2092 = vmatprep.subr.msk.bf16.mxu0 %vm2540_vm4, %v3186_v22 }
 0x547   :  { %1973 = vmatmul.mubr.msk.f32.gmra.mrb[2].mxu0 %vm890_vm2, %v2816_v6 }
 0x548   :  { %1979 = vmatprep.mubr.msk.f32.mxu0 %vm113_vm0, %v2277_v39 }
 0x54b   :  { %1980 = vmatmul.mubr.msk.f32.vlgmr.msra.gmra.mrb[4].mxu0 %vm113_vm0, %v2278_v46 }
 0x54c   :  { %1982 = vmatprep.mubr.msk.f32.mxu0 %vm113_vm0, %v2279_v28  ;;  %2094 = vmatpush3.bf16.msk.msra.mxu0 %vm2540_vm4, %v3186_v22 }
 0x54d   :  { %2096 = vmatprep.subr.msk.bf16.mxu0 %vm2547_vm5, %v3186_v22 }
 0x54f   :  { %1983 = vmatmul.mubr.msk.f32.gmra.mrb[6].mxu0 %vm113_vm0, %v2280_v40 }
 0x550   :  { %2098 = vmatpush3.bf16.msk.msra.mxu0 %vm2547_vm5, %v3186_v22  ;;  %vm3187_vm5 = vcmask 523264  }
 0x551   :  { %2100 = vmatprep.subr.msk.bf16.mxu0 %vm2561_vm8, %v3186_v22  ;;  %vm3189_vm12 = vmmov %vm3187_vm5 }
 0x552   :  { %vm3190_vm1 = vmmov %vm3187_vm5 }
 0x553   :  { %vm3191_vm6 = vmmov %vm3190_vm1 }
 0x554   :  { %2102 = vmatpush3.bf16.msk.msra.mxu0 %vm2561_vm8, %v3186_v22  ;;  %vm3188_vm8 = vmmov %vm3187_vm5 }
 0x555   :  { %2104 = vmatprep.subr.msk.bf16.mxu0 %vm2572_vm11, %v3186_v22  ;;  %vm3192_vm7 = vmmov %vm3190_vm1 }
 0x556   :  { %vm3193_vm10 = vmmov %vm3190_vm1 }
 0x558   :  { %2106 = vmatpush3.bf16.msk.msra.mxu0 %vm2572_vm11, %v3186_v22 }
 0x559   :  { %2108 = vmatprep.subr.msk.bf16.mxu0 %vm2584_vm14, %v3186_v22 }
 0x616   :  { %v2863_v35 = vpop.f32.mrb[0].mxu0 }
 0x617   :  { %v2865_v37 = vpop.f32.mrb[1].mxu0 }
 0x61a   :  { %v2867_v32 = vpop.f32.mrb[2].mxu0 }
 0x61b   :  { %v2869_v51 = vpop.f32.mrb[3].mxu0 }
 0x61e   :  { %v1981_v8 = vpop.f32.mrb[4].mxu0 }
 0x61f   :  { %v1067_v5 = vadd.f32 %v1981_v8, %v2443_v16  ;;  %v1061_v11 = vpop.f32.mrb[5].mxu0 }
 0x620   :  { %v1062_v49 = vadd.f32 %v1061_v11, %v2439_v14 }
 0x621   :  { %v1085_v57 = vmul.f32 %v1067_v5, %v2441_v15  ;;  %vm1081_vm0 = vcmp.ge.f32.partialorder %v1067_v5, 0.0 }
 0x622   :  { %v1084_v4 = vmul.f32 %v1062_v49, %v2437_v13  ;;  %v1984_v12 = vpop.f32.mrb[6].mxu0  ;;  %vm1080_vm4 = vcmp.ge.f32.partialorder %v1062_v49, 0.0 }
 0x623   :  { %v1077_v2 = vadd.f32 %v1984_v12, %v2445_v17  ;;  %v1071_v29 = vpop.f32.mrb[7].mxu0  ;;  %v2876_v0 = vsel %vm1081_vm0, %v1067_v5, %v1085_v57  ;;  %vm3194_vm0 = vmmov %vm3190_vm1 }
 0x624   :  { %v1072_v18 = vadd.f32 %v1071_v29, %v2447_v19  ;;  %v1095_v16 = vsel %vm3187_vm5, %v2876_v0, 0.0  ;;  %v2881_v44 = vsel %vm1080_vm4, %v1062_v49, %v1084_v4  ;;  %v1105_v15 = vmul.f32 %v2876_v0, %v2876_v0 }
 0x625   :  { %1096 = vadd.xlane.f32.xlu0 %v1095_v16  ;;  %v1092_v14 = vsel %vm3188_vm8, %v2881_v44, 0.0  ;;  %v1104_v13 = vmul.f32 %v2881_v44, %v2881_v44  ;;  %v1087_v17 = vmul.f32 %v1077_v2, %v2453_v26  ;;  %vm1083_vm15 = vcmp.ge.f32.partialorder %v1077_v2, 0.0 }
 0x626   :  { %v1086_v36 = vmul.f32 %v1072_v18, %v2458_v30  ;;  %1093 = vadd.xlane.f32.xlu1 %v1092_v14  ;;  %vm1082_vm11 = vcmp.ge.f32.partialorder %v1072_v18, 0.0  ;;  %v1111_v53 = vsel %vm3190_vm1, %v1105_v15, 0.0 }
 0x627   :  { %v1108_v19 = vsel %vm3189_vm12, %v1104_v13, 0.0  ;;  %v2895_v33 = vsel %vm1083_vm15, %v1077_v2, %v1087_v17 }
 0x628   :  { %v2893_v9 = vsel %vm1082_vm11, %v1072_v18, %v1086_v36  ;;  %v1101_v30 = vsel %vm3192_vm7, %v2895_v33, 0.0  ;;  %v1107_v20 = vmul.f32 %v2895_v33, %v2895_v33  ;;  %vm3197_vm7 = vmmov %vm3194_vm0 }
 0x629   :  { %1109 = vadd.xlane.f32.xlu0 %v1108_v19  ;;  %v1098_v27 = vsel %vm3191_vm6, %v2893_v9, 0.0  ;;  %v1106_v26 = vmul.f32 %v2893_v9, %v2893_v9 }
 0x62a   :  { %1112 = vadd.xlane.f32.xlu1 %v1111_v53  ;;  %v1117_v34 = vsel %vm3194_vm0, %v1107_v20, 0.0 }
 0x62b   :  { %v1114_v10 = vsel %vm3193_vm10, %v1106_v26, 0.0  ;;  %vm3198_vm10 = vmmov %vm3194_vm0 }
 0x62d   :  { %1099 = vadd.xlane.f32.xlu0 %v1098_v27 }
 0x62e   :  { %1102 = vadd.xlane.f32.xlu1 %v1101_v30 }
 0x631   :  { %1115 = vadd.xlane.f32.xlu0 %v1114_v10 }
 0x632   :  { %1118 = vadd.xlane.f32.xlu1 %v1117_v34 }
 0x6b2   :  { %v1097_v43 = vpop.xlane.xlu0 %1096 }
 0x6b3   :  { %v1094_v54 = vpop.xlane.xlu1 %1093  ;;  %v2907_v50 = vmul.f32 0.015625, %v1097_v43 }
 0x6b4   :  { %v2909_v39 = vmul.f32 0.015625, %v1094_v54 }
 0x6b5   :  { %v1129_v5 = vmul.f32 %v2907_v50, %v2907_v50 }
 0x6b6   :  { %v1128_v46 = vmul.f32 %v2909_v39, %v2909_v39  ;;  %v1110_v28 = vpop.xlane.xlu0 %1109 }
 0x6b7   :  { %v1124_v40 = vmul.f32 0.015625, %v1110_v28  ;;  %v1113_v8 = vpop.xlane.xlu1 %1112 }
 0x6b8   :  { %v1125_v11 = vmul.f32 0.015625, %v1113_v8 }
 0x6b9   :  { %v1132_v49 = vsub.f32 %v1124_v40, %v1128_v46 }
 0x6ba   :  { %v1133_v57 = vsub.f32 %v1125_v11, %v1129_v5  ;;  %v1100_v4 = vpop.xlane.xlu0 %1099 }
 0x6bb   :  { %v1136_v12 = vmax.f32 %v1132_v49, 0.0  ;;  %v2915_v2 = vmul.f32 0.015625, %v1100_v4  ;;  %v1103_v29 = vpop.xlane.xlu1 %1102 }
 0x6bc   :  { %v1137_v18 = vmax.f32 %v1133_v57, 0.0  ;;  %v2917_v16 = vmul.f32 0.015625, %v1103_v29 }
 0x6bd   :  { %2245 = vrsqrt.f32 %v1136_v12  ;;  %v1130_v13 = vmul.f32 %v2915_v2, %v2915_v2  ;;  %vm1142_vm4 = vcmp.eq.f32.partialorder %v1136_v12, inf  ;;  %v1145_v43 = vand.u32 2147483648, %v1136_v12 }
 0x6be   :  { %2247 = vrsqrt.f32 %v1137_v18  ;;  %v1116_v14 = vpop.xlane.xlu0 %1115  ;;  %v1131_v36 = vmul.f32 %v2917_v16, %v2917_v16  ;;  %vm1149_vm5 = vcmp.eq.f32.partialorder %v1137_v18, inf  ;;  %v1152_v46 = vand.u32 2147483648, %v1137_v18 }
 0x6bf   :  { %v1126_v15 = vmul.f32 0.015625, %v1116_v14  ;;  %v1119_v17 = vpop.xlane.xlu1 %1118  ;;  %vm1144_vm8 = vcmp.eq.f32.partialorder %v1136_v12, 0.0  ;;  %vm1151_vm11 = vcmp.eq.f32.partialorder %v1137_v18, 0.0 }
 0x6c0   :  { %v1127_v19 = vmul.f32 0.015625, %v1119_v17 }
 0x6c1   :  { %v1134_v53 = vsub.f32 %v1126_v15, %v1130_v13 }
 0x6c2   :  { %v1135_v27 = vsub.f32 %v1127_v19, %v1131_v36 }
 0x6c3   :  { %v1138_v26 = vmax.f32 %v1134_v53, 0.0 }
 0x6c4   :  { %v1139_v30 = vmax.f32 %v1135_v27, 0.0 }
 0x6c5   :  { %2249 = vrsqrt.f32 %v1138_v26  ;;  %vm1156_vm12 = vcmp.eq.f32.partialorder %v1138_v26, inf  ;;  %v1159_v14 = vand.u32 2147483648, %v1138_v26  ;;  %vm1158_vm1 = vcmp.eq.f32.partialorder %v1138_v26, 0.0 }
 0x6c6   :  { %2251 = vrsqrt.f32 %v1139_v30  ;;  %vm1163_vm15 = vcmp.eq.f32.partialorder %v1139_v30, inf  ;;  %v1166_v15 = vand.u32 2147483648, %v1139_v30  ;;  %vm1165_vm6 = vcmp.eq.f32.partialorder %v1139_v30, 0.0 }
 0x6c7   :  { %v2246_v20 = vpop.eup %2245 }
 0x6c8   :  { %v2248_v10 = vpop.eup %2247  ;;  %v1141_v34 = vmul.f32 %v2246_v20, %v1136_v12 }
 0x6c9   :  { %v1148_v54 = vmul.f32 %v2248_v10, %v1137_v18  ;;  %v2926_v10 = vld [vmem:[%s3144_s3] sm:$0xff] }
 0x6ca   :  { %v1143_v28 = vsel %vm1142_vm4, %v1136_v12, %v1141_v34  ;;  %vm3201_vm4 = vmmov %vm3194_vm0 }
 0x6cb   :  { %v1146_v40 = vsel %vm1144_vm8, %v1145_v43, %v1143_v28  ;;  %v1150_v8 = vsel %vm1149_vm5, %v1137_v18, %v1148_v54  ;;  %vm3202_vm5 = vmmov %vm3194_vm0 }
 0x6cc   :  { %v1168_v5 = vadd.f32 1e-05, %v1146_v40  ;;  %v1153_v11 = vsel %vm1151_vm11, %v1152_v46, %v1150_v8  ;;  %v2942_v40 = vld [vmem:[%s3144_s3 + $0x10] sm:$0xff]  ;;  %vm3207_vm11 = vmmov %vm3194_vm0 }
 0x6cd   :  { %v1169_v49 = vadd.f32 1e-05, %v1153_v11 }
 0x6ce   :  { %2253 = vrcp.f32 %v1168_v5  ;;  %v2948_v5 = vld [vmem:[%s3144_s3 + $0x18] sm:$0xff] }
 0x6cf   :  { %v2250_v57 = vpop.eup %2249  ;;  %2255 = vrcp.f32 %v1169_v49  ;;  %v3195_v49 = vmov 2  }
 0x6d0   :  { %v2252_v4 = vpop.eup %2251  ;;  %v1155_v29 = vmul.f32 %v2250_v57, %v1138_v26 }
 0x6d1   :  { %v1162_v13 = vmul.f32 %v2252_v4, %v1139_v30 }
 0x6d2   :  { %v1157_v17 = vsel %vm1156_vm12, %v1138_v26, %v1155_v29  ;;  %v2932_v26 = vld [vmem:[%s3144_s3 + $0x8] sm:$0xff]  ;;  %vm3208_vm12 = vmmov %vm3194_vm0 }
 0x6d3   :  { %v1160_v36 = vsel %vm1158_vm1, %v1159_v14, %v1157_v17  ;;  %v1164_v12 = vsel %vm1163_vm15, %v1139_v30, %v1162_v13  ;;  %v3196_v17 = vmov 7  }
 0x6d4   :  { %v1170_v19 = vadd.f32 1e-05, %v1160_v36  ;;  %v1167_v18 = vsel %vm1165_vm6, %v1166_v15, %v1164_v12  ;;  %vm3211_vm6 = vmmov %vm3194_vm0 }
 0x6d5   :  { %v1171_v53 = vadd.f32 1e-05, %v1167_v18 }
 0x6d6   :  { %2257 = vrcp.f32 %v1170_v19 }
 0x6d7   :  { %2259 = vrcp.f32 %v1171_v53 }
 0x6d8   :  { %v2254_v27 = vpop.eup %2253 }
 0x6d9   :  { %v2256_v20 = vpop.eup %2255  ;;  %v1176_v34 = vmul.f32 %v2926_v10, %v2254_v27 }
 0x6da   :  { %v1177_v30 = vmul.f32 %v2932_v26, %v2256_v20 }
 0x6db   :  { %v1180_v43 = vmul.f32 %v1176_v34, %v2909_v39 }
 0x6dc   :  { %v1181_v54 = vmul.f32 %v1177_v30, %v2907_v50 }
 0x6dd   :  { %1188 = vrot.lane.b32.xlu0 %v1180_v43, %s2337_s17 }
 0x6de   :  { %1190 = vrot.lane.b32.xlu1 %v1181_v54, %s2337_s17 }
 0x6e0   :  { %v2258_v46 = vpop.eup %2257 }
 0x6e1   :  { %v2260_v28 = vpop.eup %2259  ;;  %v1178_v8 = vmul.f32 %v2942_v40, %v2258_v46 }
 0x6e2   :  { %v1179_v50 = vmul.f32 %v2948_v5, %v2260_v28 }
 0x6e3   :  { %v1182_v39 = vmul.f32 %v1178_v8, %v2915_v2 }
 0x6e4   :  { %v1183_v11 = vmul.f32 %v1179_v50, %v2917_v16 }
 0x6e5   :  { %1192 = vrot.lane.b32.xlu1 %v1182_v39, %s2337_s17 }
 0x6e6   :  { %1194 = vrot.lane.b32.xlu0 %v1183_v11, %s2337_s17 }
 0x6e9   :  { %1206 = vperm.xlu1 %2200, %v1176_v34  }
 0x6ea   :  { %1211 = vperm.xlu0 %2201, %v1177_v30  }
 0x6ed   :  { %2202 = vset.pattern.permute.xlu1 %v3195_v49 }
 0x6ee   :  { %1216 = vperm.xlu0 %2201, %v1178_v8  }
 0x6f2   :  { %2204 = vset.pattern.permute.xlu0 %v3195_v49 }
 0x74f   :  { %v1189_v57 = vpop.permute.xlu0 %1188 }
 0x750   :  { %v1200_v4 = vsub.f32 %v2926_v10, %v1189_v57  ;;  %v1191_v29 = vpop.permute.xlu1 %1190 }
 0x751   :  { %v1201_v2 = vsub.f32 %v2932_v26, %v1191_v29 }
 0x752   :  { %1230 = vperm.xlu1 %2202, %v1200_v4  }
 0x756   :  { %1235 = vperm.xlu1 %2202, %v1201_v2  }
 0x757   :  { %v1193_v16 = vpop.permute.xlu1 %1192 }
 0x758   :  { %v1202_v14 = vsub.f32 %v2942_v40, %v1193_v16  ;;  %v1195_v13 = vpop.permute.xlu0 %1194 }
 0x759   :  { %v1203_v15 = vsub.f32 %v2948_v5, %v1195_v13 }
 0x75a   :  { %2203 = vset.pattern.permute.xlu1 %v3185_v38  ;;  %1240 = vperm.xlu0 %2204, %v1202_v14  }
 0x75b   :  { %1221 = vperm.xlu1 %2203, %v1179_v50  }
 0x75e   :  { %2207 = vset.pattern.permute.xlu0 %v3196_v17 }
 0x75f   :  { %2205 = vset.pattern.permute.xlu1 %v3195_v49  ;;  %v3204_v49 = vld [vmem:[#allocation9_spill] sm:$0xff] }
 0x760   :  { %1245 = vperm.xlu1 %2205, %v1203_v15  }
 0x764   :  { %2206 = vset.pattern.permute.xlu1 %v3196_v17  ;;  %v3209_v17 = vld [vmem:[#allocation11_spill] sm:$0xff] }
 0x768   :  { %v1207_v36 = vpop.permute.xlu1 %1206 }
 0x769   :  { %v1212_v12 = vpop.permute.xlu0 %1211  ;;  %v1224_v19 = vmul.f32 %v1207_v36, %v2881_v44 }
 0x76a   :  { %v1225_v38 = vmul.f32 %v1212_v12, %v2876_v0  ;;  %v3210_v12 = vld [vmem:[#allocation12_spill] sm:$0xff] }
 0x76d   :  { %v1217_v20 = vpop.permute.xlu0 %1216 }
 0x76e   :  { %v1226_v43 = vmul.f32 %v1217_v20, %v2893_v9 }
 0x7d1   :  { %v1231_v18 = vpop.permute.xlu1 %1230 }
 0x7d2   :  { %v1248_v53 = vadd.f32 %v1231_v18, %v1224_v19 }
 0x7d4   :  { %v1252_v27 = vmul.f32 %v1248_v53, %v2621_v7 }
 0x7d5   :  { %v1236_v34 = vpop.permute.xlu1 %1235 }
 0x7d6   :  { %v1249_v30 = vadd.f32 %v1236_v34, %v1225_v38  ;;  %2001 = vmatprep.mubr.msk.f32.mxu0 %vm3197_vm7, %v1252_v27  ;;  %vm3212_vm7 = vmmov %vm3194_vm0 }
 0x7d8   :  { %v1253_v54 = vmul.f32 %v1249_v30, %v2619_v3 }
 0x7d9   :  { %v1241_v46 = vpop.permute.xlu0 %1240 }
 0x7da   :  { %v1250_v28 = vadd.f32 %v1241_v46, %v1226_v43  ;;  %2002 = vmatmul.mubr.msk.f32.vlgmr.msra.gmra.mrb[8].mxu0 %vm3198_vm10, %v1253_v54  ;;  %v1222_v44 = vpop.permute.xlu1 %1221  ;;  %vm3213_vm10 = vmmov %vm3194_vm0 }
 0x7db   :  { %2110 = vmatpush3.bf16.msk.msra.mxu0 %vm2584_vm14, %v3186_v22  ;;  %v1227_v0 = vmul.f32 %v1222_v44, %v2895_v33  ;;  %vm3199_vm14 = vmmov %vm3194_vm0  ;;  %v1357_v33 = vmul.f32 %v1248_v53, %v2688_v58 }
 0x7dc   :  { %v1254_v7 = vmul.f32 %v1250_v28, %v2651_v31  ;;  %2112 = vmatprep.subr.msk.bf16.mxu0 %vm2632_vm13, %v3186_v22  ;;  %v1365_v31 = vmul.f32 %v1248_v53, %v2663_v42  ;;  %v1367_v25 = vmul.f32 %v1250_v28, %v2673_v45  ;;  %v1358_v42 = vmul.f32 %v1249_v30, %v2682_v52  ;;  %v3205_v52 = vld [vmem:[#allocation10_spill] sm:$0xff] }
 0x7dd   :  { %v1359_v45 = vmul.f32 %v1250_v28, %v2686_v56 }
 0x7de   :  { %2004 = vmatprep.mubr.msk.f32.mxu0 %vm3194_vm0, %v1254_v7  ;;  %v2139_v8 = vadd.f32 %v1358_v42, %v2692_v61  ;;  %v3206_v61 = vld [vmem:[#allocation8_spill] sm:$0xff] }
 0x7df   :  { %2114 = vmatpush3.bf16.msk.msra.mxu0 %vm2632_vm13, %v3186_v22  ;;  %v1246_v3 = vpop.permute.xlu1 %1245  ;;  %vm3200_vm13 = vmmov %vm3194_vm0  ;;  %v2145_v29 = vadd.f32 %v1359_v45, %v3206_v61 }
 0x7e0   :  { %v1251_v9 = vadd.f32 %v1246_v3, %v1227_v0  ;;  %2116 = vmatprep.subr.msk.bf16.mxu0 %vm2594_vm3, %v3186_v22 }
 0x7e2   :  { %v1255_v59 = vmul.f32 %v1251_v9, %v2629_v24  ;;  %v1366_v24 = vmul.f32 %v1249_v30, %v2661_v41  ;;  %v1368_v62 = vmul.f32 %v1251_v9, %v2678_v47  ;;  %v1360_v63 = vmul.f32 %v1251_v9, %v2690_v60 }
 0x7e3   :  { %2118 = vmatpush3.bf16.msk.msra.mxu0 %vm2594_vm3, %v3186_v22  ;;  %vm3203_vm3 = vmmov %vm3194_vm0  ;;  %v2141_v41 = vadd.f32 %v1357_v33, %v2684_v55 }
 0x7e4   :  { %2005 = vmatmul.mubr.msk.f32.gmra.mrb[10].mxu0 %vm3199_vm14, %v1255_v59  ;;  %2120 = vmatprep.subr.msk.bf16.mxu0 %vm2600_vm9, %v3186_v22  ;;  %v2143_v57 = vadd.f32 %v1360_v63, %v3204_v49  ;;  %vm3214_vm14 = vmmov %vm3194_vm0 }
 0x7e5   :  { %2023 = vmatprep.mubr.msk.f32.mxu0 %vm3200_vm13, %v1365_v31  ;;  %vm3215_vm13 = vmmov %vm3194_vm0 }
 0x7e7   :  { %2122 = vmatpush3.bf16.msk.msra.mxu0 %vm2600_vm9, %v3186_v22 }
 0x7ea   :  { %2024 = vmatmul.mubr.msk.f32.vlgmr.msra.gmra.mrb[8].mxu0 %vm3201_vm4, %v1366_v24 }
 0x7eb   :  { %2026 = vmatprep.mubr.msk.f32.mxu0 %vm3202_vm5, %v1367_v25 }
 0x7ee   :  { %2027 = vmatmul.mubr.msk.f32.gmra.mrb[10].mxu0 %vm3203_vm3, %v1368_v62 }
 0x8bd   :  { %v2025_v22 = vpop.f32.mrb[8].mxu0 }
 0x8be   :  { %v2140_v50 = vadd.f32 %v2139_v8, %v2025_v22  ;;  %v1447_v39 = vpop.f32.mrb[9].mxu0 }
 0x8bf   :  { %v2142_v11 = vadd.f32 %v2141_v41, %v1447_v39 }
 0x8c0   :  { %v1475_v47 = vmul.f32 %v2140_v50, %v2703_v23  ;;  %vm1471_vm9 = vcmp.ge.f32.partialorder %v2140_v50, 0.0 }
 0x8c1   :  { %vm1470_vm8 = vcmp.ge.f32.partialorder %v2142_v11, 0.0  ;;  %v1474_v58 = vmul.f32 %v2142_v11, %v3205_v52  ;;  %v2028_v4 = vpop.f32.mrb[10].mxu0 }
 0x8c2   :  { %v2144_v60 = vadd.f32 %v2143_v57, %v2028_v4  ;;  %v1457_v2 = vpop.f32.mrb[11].mxu0  ;;  %v3016_v16 = vsel %vm1471_vm9, %v2140_v50, %v1475_v47 }
 0x8c3   :  { %v2146_v55 = vadd.f32 %v2145_v29, %v1457_v2  ;;  %v1485_v56 = vsel %vm3207_vm11, %v3016_v16, 0.0  ;;  %v3020_v14 = vsel %vm1470_vm8, %v2142_v11, %v1474_v58  ;;  %v1495_v15 = vmul.f32 %v3016_v16, %v3016_v16 }
 0x8c4   :  { %1486 = vadd.xlane.f32.xlu0 %v1485_v56  ;;  %v1482_v23 = vsel %vm3208_vm12, %v3020_v14, 0.0  ;;  %v1494_v13 = vmul.f32 %v3020_v14, %v3020_v14  ;;  %v1477_v36 = vmul.f32 %v2144_v60, %v3209_v17  ;;  %vm1473_vm1 = vcmp.ge.f32.partialorder %v2144_v60, 0.0 }
 0x8c5   :  { %v1476_v19 = vmul.f32 %v2146_v55, %v3210_v12  ;;  %1483 = vadd.xlane.f32.xlu1 %v1482_v23  ;;  %vm1472_vm15 = vcmp.ge.f32.partialorder %v2146_v55, 0.0  ;;  %v1501_v53 = vsel %vm3212_vm7, %v1495_v15, 0.0  ;;  %vm3219_vm7 = vmmov %vm3194_vm0 }
 0x8c6   :  { %v1498_v18 = vsel %vm3211_vm6, %v1494_v13, 0.0  ;;  %v3034_v27 = vsel %vm1473_vm1, %v2144_v60, %v1477_v36  ;;  %vm3217_vm1 = vmmov %vm3194_vm0 }
 0x8c7   :  { %v3032_v38 = vsel %vm1472_vm15, %v2146_v55, %v1476_v19  ;;  %v1491_v30 = vsel %vm3194_vm0, %v3034_v27, 0.0  ;;  %v1497_v43 = vmul.f32 %v3034_v27, %v3034_v27  ;;  %vm3218_vm6 = vmmov %vm3194_vm0 }
 0x8c8   :  { %1499 = vadd.xlane.f32.xlu0 %v1498_v18  ;;  %v1488_v20 = vsel %vm3213_vm10, %v3032_v38, 0.0  ;;  %v1496_v34 = vmul.f32 %v3032_v38, %v3032_v38  ;;  %vm3220_vm10 = vmmov %vm3194_vm0 }
 0x8c9   :  { %1502 = vadd.xlane.f32.xlu1 %v1501_v53  ;;  %v1507_v46 = vsel %vm3215_vm13, %v1497_v43, 0.0 }
 0x8ca   :  { %v1504_v54 = vsel %vm3214_vm14, %v1496_v34, 0.0  ;;  %vm3221_vm14 = vmmov %vm3194_vm0 }
 0x8cc   :  { %1489 = vadd.xlane.f32.xlu0 %v1488_v20 }
 0x8cd   :  { %1492 = vadd.xlane.f32.xlu1 %v1491_v30 }
 0x8d0   :  { %1505 = vadd.xlane.f32.xlu0 %v1504_v54 }
 0x8d1   :  { %1508 = vadd.xlane.f32.xlu1 %v1507_v46 }
 0x951   :  { %v1487_v28 = vpop.xlane.xlu0 %1486 }
 0x952   :  { %v1484_v44 = vpop.xlane.xlu1 %1483  ;;  %v3046_v7 = vmul.f32 0.015625, %v1487_v28 }
 0x953   :  { %v3048_v0 = vmul.f32 0.015625, %v1484_v44 }
 0x954   :  { %v1519_v24 = vmul.f32 %v3046_v7, %v3046_v7 }
 0x955   :  { %v1518_v3 = vmul.f32 %v3048_v0, %v3048_v0  ;;  %v1500_v9 = vpop.xlane.xlu0 %1499 }
 0x956   :  { %v1514_v59 = vmul.f32 0.015625, %v1500_v9  ;;  %v1503_v31 = vpop.xlane.xlu1 %1502 }
 0x957   :  { %v1515_v25 = vmul.f32 0.015625, %v1503_v31 }
 0x958   :  { %v1522_v62 = vsub.f32 %v1514_v59, %v1518_v3 }
 0x959   :  { %v1523_v42 = vsub.f32 %v1515_v25, %v1519_v24  ;;  %v1490_v33 = vpop.xlane.xlu0 %1489 }
 0x95a   :  { %v1526_v8 = vmax.f32 %v1522_v62, 0.0  ;;  %v3054_v63 = vmul.f32 0.015625, %v1490_v33  ;;  %v1493_v22 = vpop.xlane.xlu1 %1492 }
 0x95b   :  { %v1527_v41 = vmax.f32 %v1523_v42, 0.0  ;;  %v3056_v45 = vmul.f32 0.015625, %v1493_v22 }
 0x95c   :  { %2261 = vrsqrt.f32 %v1526_v8  ;;  %v1520_v39 = vmul.f32 %v3054_v63, %v3054_v63  ;;  %vm1532_vm4 = vcmp.eq.f32.partialorder %v1526_v8, inf  ;;  %v1535_v55 = vand.u32 2147483648, %v1526_v8 }
 0x95d   :  { %2263 = vrsqrt.f32 %v1527_v41  ;;  %v1506_v50 = vpop.xlane.xlu0 %1505  ;;  %v1521_v49 = vmul.f32 %v3056_v45, %v3056_v45  ;;  %vm1539_vm5 = vcmp.eq.f32.partialorder %v1527_v41, inf  ;;  %v1542_v23 = vand.u32 2147483648, %v1527_v41 }
 0x95e   :  { %v1516_v11 = vmul.f32 0.015625, %v1506_v50  ;;  %v1509_v47 = vpop.xlane.xlu1 %1508  ;;  %vm1534_vm3 = vcmp.eq.f32.partialorder %v1526_v8, 0.0  ;;  %vm1541_vm9 = vcmp.eq.f32.partialorder %v1527_v41, 0.0 }
 0x95f   :  { %v1517_v57 = vmul.f32 0.015625, %v1509_v47 }
 0x960   :  { %v1524_v52 = vsub.f32 %v1516_v11, %v1520_v39 }
 0x961   :  { %v1525_v58 = vsub.f32 %v1517_v57, %v1521_v49 }
 0x962   :  { %v1528_v4 = vmax.f32 %v1524_v52, 0.0  ;;  %v37_v52 = vld [vmem:[%s3145_s4 + $0x8] sm:$0xff] }
 0x963   :  { %v1529_v61 = vmax.f32 %v1525_v58, 0.0  ;;  %v3216_v58 = vmov 0  }
 0x964   :  { %2265 = vrsqrt.f32 %v1528_v4  ;;  %vm1546_vm8 = vcmp.eq.f32.partialorder %v1528_v4, inf  ;;  %v1549_v34 = vand.u32 2147483648, %v1528_v4  ;;  %vm1548_vm11 = vcmp.eq.f32.partialorder %v1528_v4, 0.0 }
 0x965   :  { %2267 = vrsqrt.f32 %v1529_v61  ;;  %vm1553_vm12 = vcmp.eq.f32.partialorder %v1529_v61, inf  ;;  %v1556_v54 = vand.u32 2147483648, %v1529_v61  ;;  %vm1555_vm15 = vcmp.eq.f32.partialorder %v1529_v61, 0.0 }
 0x966   :  { %v2262_v29 = vpop.eup %2261 }
 0x967   :  { %v2264_v60 = vpop.eup %2263  ;;  %v1531_v2 = vmul.f32 %v2262_v29, %v1526_v8 }
 0x968   :  { %v1538_v56 = vmul.f32 %v2264_v60, %v1527_v41 }
 0x969   :  { %v1533_v13 = vsel %vm1532_vm4, %v1526_v8, %v1531_v2 }
 0x96a   :  { %v1540_v15 = vsel %vm1539_vm5, %v1527_v41, %v1538_v56  ;;  %v1536_v17 = vsel %vm1534_vm3, %v1535_v55, %v1533_v13 }
 0x96b   :  { %v1558_v36 = vadd.f32 1e-05, %v1536_v17  ;;  %v1543_v12 = vsel %vm1541_vm9, %v1542_v23, %v1540_v15 }
 0x96c   :  { %v1559_v19 = vadd.f32 1e-05, %v1543_v12 }
 0x96d   :  { %2269 = vrcp.f32 %v1558_v36 }
 0x96e   :  { %v2266_v18 = vpop.eup %2265  ;;  %2271 = vrcp.f32 %v1559_v19 }
 0x96f   :  { %v2268_v53 = vpop.eup %2267  ;;  %v1545_v20 = vmul.f32 %v2266_v18, %v1528_v4 }
 0x970   :  { %v1552_v30 = vmul.f32 %v2268_v53, %v1529_v61 }
 0x971   :  { %v1547_v43 = vsel %vm1546_vm8, %v1528_v4, %v1545_v20 }
 0x972   :  { %v1550_v46 = vsel %vm1548_vm11, %v1549_v34, %v1547_v43  ;;  %v1554_v28 = vsel %vm1553_vm12, %v1529_v61, %v1552_v30 }
 0x973   :  { %v1560_v44 = vadd.f32 1e-05, %v1550_v46  ;;  %v1557_v3 = vsel %vm1555_vm15, %v1556_v54, %v1554_v28 }
 0x974   :  { %v1561_v9 = vadd.f32 1e-05, %v1557_v3 }
 0x975   :  { %2273 = vrcp.f32 %v1560_v44 }
 0x976   :  { %2275 = vrcp.f32 %v1561_v9 }
 0x977   :  { %v2270_v59 = vpop.eup %2269 }
 0x978   :  { %v2272_v31 = vpop.eup %2271  ;;  %v1566_v24 = vmul.f32 %v2926_v10, %v2270_v59 }
 0x979   :  { %v1567_v25 = vmul.f32 %v2932_v26, %v2272_v31 }
 0x97a   :  { %v1570_v62 = vmul.f32 %v1566_v24, %v3048_v0 }
 0x97b   :  { %v1571_v42 = vmul.f32 %v1567_v25, %v3046_v7 }
 0x97c   :  { %1578 = vrot.lane.b32.xlu0 %v1570_v62, %s2337_s17 }
 0x97d   :  { %1580 = vrot.lane.b32.xlu1 %v1571_v42, %s2337_s17 }
 0x97f   :  { %v2274_v33 = vpop.eup %2273 }
 0x980   :  { %v2276_v8 = vpop.eup %2275  ;;  %v1568_v22 = vmul.f32 %v2942_v40, %v2274_v33 }
 0x981   :  { %v1569_v41 = vmul.f32 %v2948_v5, %v2276_v8 }
 0x982   :  { %v1572_v50 = vmul.f32 %v1568_v22, %v3054_v63 }
 0x983   :  { %v1573_v39 = vmul.f32 %v1569_v41, %v3056_v45 }
 0x984   :  { %1582 = vrot.lane.b32.xlu1 %v1572_v50, %s2337_s17 }
 0x985   :  { %1584 = vrot.lane.b32.xlu0 %v1573_v39, %s2337_s17 }
 0x988   :  { %1596 = vperm.xlu1 %2206, %v1566_v24  }
 0x989   :  { %1601 = vperm.xlu0 %2207, %v1567_v25  }
 0x98c   :  { %1611 = vperm.xlu1 %2206, %v1569_v41  }
 0x98d   :  { %1606 = vperm.xlu0 %2207, %v1568_v22  }
 0x990   :  { %2208 = vset.pattern.permute.xlu1 %v2345_v48 }
 0x991   :  { %2209 = vset.pattern.permute.xlu0 %v2345_v48 }
 0x9ee   :  { %v1579_v11 = vpop.permute.xlu0 %1578 }
 0x9ef   :  { %v1581_v7 = vpop.permute.xlu1 %1580  ;;  %v1590_v63 = vsub.f32 %v2926_v10, %v1579_v11  ;;  %v38_v10 = vld [vmem:[%s3145_s4 + $0x10] sm:$0xff] }
 0x9f0   :  { %v1591_v0 = vsub.f32 %v2932_v26, %v1581_v7  ;;  %v36_v26 = vld [vmem:[%s3145_s4] sm:$0xff] }
 0x9f2   :  { %1625 = vperm.xlu1 %2208, %v1591_v0  }
 0x9f6   :  { %v1583_v45 = vpop.permute.xlu1 %1582  ;;  %1620 = vperm.xlu1 %2208, %v1590_v63  }
 0x9f7   :  { %v1592_v47 = vsub.f32 %v2942_v40, %v1583_v45  ;;  %v1585_v49 = vpop.permute.xlu0 %1584  ;;  %v39_v40 = vld [vmem:[%s3145_s4 + $0x18] sm:$0xff]  ;;  %s2346_s4 = smov [#allocation2]  }
 0x9f8   :  { %v1593_v57 = vsub.f32 %v2948_v5, %v1585_v49  ;;  %s1738_s26 = sshll.u32 %s2346_s4, 4  ;;  %s1739_s26 = int_to_ptr.vmem [resolvable:$true] %s1738_s26 }
 0x9f9   :  { %1630 = vperm.xlu0 %2209, %v1592_v47   ;;  %s2285_s28 = scalar_lea.vmem %s1739_s26, 512  ;;  %p2290_p1 = scmp.lt.s32.totalorder %s1739_s26, %s1739_s26 }
 0x9fa   :  { %1635 = vperm.xlu1 %2208, %v1593_v57   ;;  %p2286_p0 = scmp.ne.s32.totalorder %s1739_s26, %s2285_s28  ;;  %p2291_p2 = scmp.lt.s32.totalorder %s2285_s28, %s2285_s28 }
 0x9fc   :  { %p2292_p3 = por %p2291_p2, %p2290_p1 }
 0x9fd   :  { %2211 = vset.pattern.permute.xlu0 %v3216_v58 }
 0x9fe   :  { %877 = vperm.xlu0 %2211, %v37_v52   ;;  %2210 = vset.pattern.permute.xlu1 %v3216_v58  ;;  %p2293_p4 = pnand %p2292_p3, %p2286_p0 }
 0x9ff   :  { %872 = vperm.xlu1 %2210, %v36_v26  }
 0xa02   :  { %2212 = vset.pattern.permute.xlu0 %v2345_v48 }
 0xa03   :  { %882 = vperm.xlu1 %2210, %v38_v10  }
 0xa07   :  { %887 = vperm.xlu1 %2210, %v39_v40   ;;  %v1597_v5 = vpop.permute.xlu1 %1596 }
 0xa08   :  { %v1602_v61 = vpop.permute.xlu0 %1601  ;;  %v1614_v60 = vmul.f32 %v1597_v5, %v3020_v14 }
 0xa09   :  { %v1615_v2 = vmul.f32 %v1602_v61, %v3016_v16 }
 0xa0b   :  { %v1612_v4 = vpop.permute.xlu1 %1611 }
 0xa0c   :  { %v1607_v55 = vpop.permute.xlu0 %1606  ;;  %v1617_v15 = vmul.f32 %v1612_v4, %v3034_v27 }
 0xa0d   :  { %v1616_v48 = vmul.f32 %v1607_v55, %v3032_v38 }
 0xa71   :  { %v1626_v29 = vpop.permute.xlu1 %1625 }
 0xa72   :  { %v1639_v23 = vadd.f32 %v1626_v29, %v1615_v2 }
 0xa75   :  { %v1621_v56 = vpop.permute.xlu1 %1620 }
 0xa76   :  { %v1638_v13 = vadd.f32 %v1621_v56, %v1614_v60 }
 0xa78   :  { %v2123_v17 = vpack.c.bf16 %v1639_v23, %v1638_v13  ;;  %v1631_v36 = vpop.permute.xlu0 %1630 }
 0xa79   :  { %v1640_v12 = vadd.f32 %v1631_v36, %v1616_v48  ;;  %v1636_v19 = vpop.permute.xlu1 %1635 }
 0xa7a   :  { %v1641_v18 = vadd.f32 %v1636_v19, %v1617_v15  ;;  %2124 = vmatprep.subr.bf16.mxu1 %v2123_v17 }
 0xa7b   :  { %2126 = vmatpush3.bf16.msra.mxu1 %v2123_v17 }
 0xa7c   :  { %v2127_v53 = vpack.c.bf16 %v1641_v18, %v1640_v12 }
 0xa7d   :  { %v878_v20 = vpop.permute.xlu0 %877 }
 0xa7e   :  { %v975_v14 = vadd.f32 %v2863_v35, %v878_v20  ;;  %v873_v16 = vpop.permute.xlu1 %872  ;;  %2128 = vmatprep.subr.bf16.mxu1 %v2127_v53 }
 0xa7f   :  { %v970_v34 = vadd.f32 %v2865_v37, %v873_v16  ;;  %2130 = vmatpush3.bf16.msra.mxu1 %v2127_v53 }
 0xa80   :  { %989 = vst.msk [vmem:[#allocation2 + $0x8] sm:$0xff] %vm3217_vm1, %v975_v14 }
 0xa81   :  { %988 = vst.msk [vmem:[#allocation2] sm:$0xff] %vm3218_vm6, %v970_v34 }
 0xa82   :  { %v883_v38 = vpop.permute.xlu1 %882  ;;  %2038 = vmatmul.mubr.msk.f32.vlgmr.msra.gmra.mrb[8].mxu1 %vm890_vm2, %v2802_v1 }
 0xa83   :  { %v980_v27 = vadd.f32 %v2869_v51, %v883_v38  ;;  %2040 = vmatprep.mubr.msk.f32.mxu1 %vm890_vm2, %v2807_v21 }
 0xa85   :  { %990 = vst.msk [vmem:[#allocation4] sm:$0xff] %vm3219_vm7, %v980_v27 }
 0xa86   :  { %v888_v35 = vpop.permute.xlu1 %887  ;;  %2041 = vmatmul.mubr.msk.f32.gmra.mrb[10].mxu1 %vm890_vm2, %v2816_v6 }
 0xa87   :  { %v985_v37 = vadd.f32 %v2867_v32, %v888_v35 }
 0xa89   :  { %991 = vst.msk [vmem:[#allocation4 + $0x8] sm:$0xff] %vm3220_vm10, %v985_v37 }
 0xb55   :  { %v2039_v30 = vpop.f32.mrb[8].mxu1 }
 0xb56   :  { %v1714_v43 = vadd.f32 %v2039_v30, %v878_v20  ;;  %v1708_v1 = vpop.f32.mrb[9].mxu1 }
 0xb57   :  { %v1709_v54 = vadd.f32 %v1708_v1, %v873_v16 }
 0xb58   :  { %1729 = vst.msk [vmem:[#allocation2 + $0x18] sm:$0xff] %vm3194_vm0, %v1714_v43 }
 0xb59   :  { %1728 = vst.msk [vmem:[#allocation2 + $0x10] sm:$0xff] %vm3221_vm14, %v1709_v54  ;;  %v2042_v21 = vpop.f32.mrb[10].mxu1 }
 0xb5a   :  { %v1724_v51 = vadd.f32 %v2042_v21, %v888_v35  ;;  %v1718_v6 = vpop.f32.mrb[11].mxu1 }
 0xb5b   :  { %2296 = shalt.err (!%p2293_p4)
}
 0xb5c   :  { %s2297_s7 = scalar_lea.hbm %s3146_s5, 512 }
 0xb5d   :  { %p2298_p5 = scmp.ne.s32.totalorder %s3146_s5, %s2297_s7  ;;  %p2301_p6 = scmp.lt.u32.totalorder %s2297_s7, %s3146_s5 }
 0xb5f   :  { %p2303_p7 = pnand %p2301_p6, %p2298_p5 }
 0xb61   :  { %2306 = shalt.err (!%p2303_p7)
}
 0xb62   :  { %s2348_s11 = smov 128   ;;  %s2349_s1 = smov 8   ;;  %v1719_v32 = vadd.f32 %v1718_v6, %v883_v38  ;;  %vm3222_vm2 = vmmov %vm3194_vm0 }
 0xb63   :  { %1744 = dma.vmem_to_hbm [thread:$0]  %s1739_s26, 512, %s3146_s5, [#allocation3], %s2348_s11, %s2348_s11, %s2349_s1   ;;  %1732 = vst.msk [vmem:[#allocation4 + $0x18] sm:$0xff] %vm3222_vm2, %v1724_v51  ;;  %vm3223_vm13 = vmmov %vm3194_vm0 }
 0xb64   :  { %1731 = vst.msk [vmem:[#allocation4 + $0x10] sm:$0xff] %vm3223_vm13, %v1719_v32  ;;  %s2307_s14 = scalar_lea.vmem %s1751_s0, 512  ;;  %p2312_p9 = scmp.lt.s32.totalorder %s1751_s0, %s1751_s0 }
 0xb65   :  { %p2308_p8 = scmp.ne.s32.totalorder %s1751_s0, %s2307_s14  ;;  %p2313_p10 = scmp.lt.s32.totalorder %s2307_s14, %s2307_s14 }
 0xb67   :  { %p2314_p11 = por %p2313_p10, %p2312_p9 }
 0xb69   :  { %p2315_p12 = pnand %p2314_p11, %p2308_p8 }
 0xb6b   :  { %2318 = shalt.err (!%p2315_p12)
}
 0xb6c   :  { %s2319_s18 = scalar_lea.hbm %s3147_s6, 512 }
 0xb6d   :  { %p2320_p13 = scmp.ne.s32.totalorder %s3147_s6, %s2319_s18  ;;  %p2323_p0 = scmp.lt.u32.totalorder %s2319_s18, %s3147_s6 }
 0xb6f   :  { %p2325_p1 = pnand %p2323_p0, %p2320_p13 }
 0xb71   :  { %2328 = shalt.err (!%p2325_p1)
}
 0xb72   :  { %1756 = dma.vmem_to_hbm [thread:$0]  %s1751_s0, 512, %s3147_s6, [#allocation5], %s2348_s11, %s2348_s11, %s2349_s1  }
 0xb73   :  { %2329 = dma.done.wait [#allocation3], 512  }
 0xb74   :  { %2330 = vsyncadd [#allocation3], 4294966784 }
 0xb75   :  { %2331 = dma.done.wait [#allocation5], 512  }
 0xb76   :  { %2332 = vsyncadd [#allocation5], 4294966784 }
 0xb77   :  { %1763 = vsyncpa [#allocation3], 1 }
 0xb78   :  { %1764 = vsyncpa [#allocation5], 1 }

</bundles_post_ra>
